<compile_context>
chip_gen: v6e
topology: v6e:2x2x1
jax: 0.10.0
libtpu: 0.0.40
codegen_flags: <defaults>
</compile_context>

<pallas_src>
import functools

import jax
import jax.numpy as jnp
from jax.experimental import pallas as pl
from jax.experimental.pallas import tpu as pltpu

FILTER_SIZES = (1, 2, 3, 5)
NUM_FILTERS = 36
N_CLASSES = 7
EMBED = 201

KMAX = max(FILTER_SIZES)                       # 5
F_TOTAL = len(FILTER_SIZES) * NUM_FILTERS      # 144
E_PAD = 256                                    # embedding dim padded to 2 lanes
NCLS_PAD = 128                                 # lane-dense FC output width
NEG_INF = -1e30


def cnn_text_kernel(x_ref, w_ref, b_ref, mask_ref, wfc_ref, bfc_ref, out_ref):
    TB, L_pad, E = x_ref.shape                 # (batch tile, L + KMAX-1, E_pad)
    _, _, F = w_ref.shape                      # (KMAX, E_pad, 144)
    L = L_pad - (KMAX - 1)                     # real sequence length

    x = x_ref[...]                             # (TB, L_pad, E) bf16

    # Fused conv for all 4 filter banks: one (TB*L, E) @ (E, 144) dot per tap,
    # accumulated into a single f32 accumulator (MXU-friendly chained dots).
    acc = jnp.dot(x[:, 0:L, :].reshape(TB * L, E), w_ref[0],
                  preferred_element_type=jnp.float32)
    for k in range(1, KMAX):
        acc = acc + jnp.dot(x[:, k:k + L, :].reshape(TB * L, E), w_ref[k],
                            preferred_element_type=jnp.float32)

    acc = jnp.maximum(acc + b_ref[...], 0.0)           # bias + ReLU (f32)
    acc = acc.reshape(TB, L, F) + mask_ref[...]        # -1e30 on invalid tail steps
    feat = jnp.max(acc, axis=1)                        # max-over-time -> (TB, 144)

    # TODO(synk): nn.Dropout(0.1) is eval-mode identity here; training-mode
    # stochastic masking (pltpu.prng_*) is intentionally not applied.
    logits = jnp.dot(feat, wfc_ref[...], preferred_element_type=jnp.float32)
    out_ref[...] = (logits + bfc_ref[...]).astype(out_ref.dtype)


def _pack_params(params, seq_len):
    """Fuse the 4 filter banks into one padded 5-tap weight + masks (host side)."""
    w_fused = jnp.zeros((KMAX, E_PAD, F_TOTAL), jnp.float32)
    b_fused = jnp.zeros((1, F_TOTAL), jnp.float32)
    mask = jnp.zeros((seq_len, F_TOTAL), jnp.float32)
    for j, K in enumerate(FILTER_SIZES):
        c0 = j * NUM_FILTERS
        w = params[f"w{K}"]                               # (K, E, F)
        w_fused = w_fused.at[:K, :EMBED, c0:c0 + NUM_FILTERS].set(w)
        b_fused = b_fused.at[:, c0:c0 + NUM_FILTERS].set(params[f"b{K}"])
        T = seq_len - K + 1                               # valid conv length
        mask = mask.at[T:, c0:c0 + NUM_FILTERS].set(NEG_INF)
    wfc = jnp.zeros((F_TOTAL, NCLS_PAD), jnp.float32)
    wfc = wfc.at[:, :N_CLASSES].set(params["wfc"])
    bfc = jnp.zeros((1, NCLS_PAD), jnp.float32)
    bfc = bfc.at[:, :N_CLASSES].set(params["bfc"])
    return w_fused.astype(jnp.bfloat16), b_fused, mask, wfc, bfc


@functools.partial(jax.jit, static_argnames=("tb",))
def cnn_text_forward(x, params, *, tb=8):
    B, L, E = x.shape
    assert E == EMBED and L >= KMAX
    w_fused, b_fused, mask, wfc, bfc = _pack_params(params, L)

    # Pad batch to the tile size and pad the sequence by KMAX-1 zero time steps
    # so every tap slice x[:, k:k+L, :] is in range; pad E -> 256.
    B_pad = pl.cdiv(B, tb) * tb
    L_pad = L + (KMAX - 1)
    x_p = jnp.zeros((B_pad, L_pad, E_PAD), jnp.bfloat16)
    x_p = x_p.at[:B, :L, :EMBED].set(x.astype(jnp.bfloat16))

    out = pl.pallas_call(
        cnn_text_kernel,
        out_shape=jax.ShapeDtypeStruct((B_pad, NCLS_PAD), jnp.float32),
        grid_spec=pltpu.PrefetchScalarGridSpec(
            num_scalar_prefetch=0,
            grid=(B_pad // tb,),
            in_specs=[
                pl.BlockSpec((tb, L_pad, E_PAD), lambda i: (i, 0, 0)),
                pl.BlockSpec((KMAX, E_PAD, F_TOTAL), lambda i: (0, 0, 0)),
                pl.BlockSpec((1, F_TOTAL), lambda i: (0, 0)),
                pl.BlockSpec((L, F_TOTAL), lambda i: (0, 0)),
                pl.BlockSpec((F_TOTAL, NCLS_PAD), lambda i: (0, 0)),
                pl.BlockSpec((1, NCLS_PAD), lambda i: (0, 0)),
            ],
            out_specs=pl.BlockSpec((tb, NCLS_PAD), lambda i: (i, 0)),
        ),
        compiler_params=pltpu.CompilerParams(
            dimension_semantics=("parallel",)),
    )(x_p, w_fused, b_fused, mask, wfc, bfc)
    return out[:B, :N_CLASSES]


def reference_forward(x, params):
    """Plain-JAX f32 reference mirroring the PyTorch forward (eval mode)."""
    B, L, E = x.shape
    pooled = []
    for K in FILTER_SIZES:
        w = params[f"w{K}"]            # (K, E, F)
        bias = params[f"b{K}"][0]      # (F,)
        T = L - K + 1
        acc = jnp.zeros((B, T, NUM_FILTERS), jnp.float32)
        for k in range(K):
            acc = acc + jnp.einsum("ble,ef->blf", x[:, k:k + T, :], w[k])
        acc = jax.nn.relu(acc + bias)
        pooled.append(jnp.max(acc, axis=1))                     # (B, F)
    feat = jnp.concatenate(pooled, axis=1)                      # (B, 4*F)
    return feat @ params["wfc"] + params["bfc"]                 # (B, n_classes)


if __name__ == "__main__":
    key = jax.random.PRNGKey(0)
    B, L = 2, 8                       # small shapes; L must be >= max filter size (5)

    keys = jax.random.split(key, 2 * len(FILTER_SIZES) + 3)
    ki = 0
    params = {}
    for K in FILTER_SIZES:
        # PyTorch Conv2d weight (F, 1, K, E) stored here transposed as (K, E, F).
        params[f"w{K}"] = 0.05 * jax.random.normal(
            keys[ki], (K, EMBED, NUM_FILTERS), jnp.float32); ki += 1
        params[f"b{K}"] = 0.05 * jax.random.normal(
            keys[ki], (1, NUM_FILTERS), jnp.float32); ki += 1
    # PyTorch Linear weight (n_classes, 4*F) stored here transposed as (4*F, n_classes).
    params["wfc"] = 0.05 * jax.random.normal(
        keys[ki], (len(FILTER_SIZES) * NUM_FILTERS, N_CLASSES), jnp.float32); ki += 1
    params["bfc"] = 0.05 * jax.random.normal(
        keys[ki], (1, N_CLASSES), jnp.float32); ki += 1

    x = jax.random.normal(keys[ki], (B, L, EMBED), jnp.float32)

    out = jax.block_until_ready(cnn_text_forward(x, params))
    ref = reference_forward(x, params)
    assert out.shape == (B, N_CLASSES)
    # bf16 conv operands (f32 accumulate) -> loosened tolerance vs f32 reference.
    assert jnp.allclose(out, ref, atol=5e-2, rtol=5e-2), (out, ref)
    print("KERNEL_OK")
</pallas_src>

<mosaic_0001>
module attributes {stable_mosaic.version = 11 : i64} {
  func.func @cnn_text_kernel(%arg0: i32, %arg1: memref<8x12x256xbf16, #tpu.memory_space<vmem>>, %arg2: memref<5x256x144xbf16, #tpu.memory_space<vmem>>, %arg3: memref<1x144xf32, #tpu.memory_space<vmem>>, %arg4: memref<8x144xf32, #tpu.memory_space<vmem>>, %arg5: memref<144x128xf32, #tpu.memory_space<vmem>>, %arg6: memref<1x128xf32, #tpu.memory_space<vmem>>, %arg7: memref<8x128xf32, #tpu.memory_space<vmem>>) attributes {dimension_semantics = [#tpu.dimension_semantics<parallel>], iteration_bounds = array<i64: 1>, scalar_prefetch = 0 : i64, scratch_operands = 0 : i64, tpu.core_type = #tpu.core_type<tc>, window_params = [{transform_indices = @transform_0, window_bounds = array<i64: 8, 12, 256>}, {pipeline_mode = #tpu.pipeline_mode<synchronous>, transform_indices = @transform_1, window_bounds = array<i64: 5, 256, 144>}, {pipeline_mode = #tpu.pipeline_mode<synchronous>, transform_indices = @transform_2, window_bounds = array<i64: 1, 144>}, {pipeline_mode = #tpu.pipeline_mode<synchronous>, transform_indices = @transform_3, window_bounds = array<i64: 8, 144>}, {pipeline_mode = #tpu.pipeline_mode<synchronous>, transform_indices = @transform_4, window_bounds = array<i64: 144, 128>}, {pipeline_mode = #tpu.pipeline_mode<synchronous>, transform_indices = @transform_5, window_bounds = array<i64: 1, 128>}, {transform_indices = @transform_6, window_bounds = array<i64: 8, 128>}]} {
    %c0 = arith.constant 0 : index
    %c0_0 = arith.constant 0 : index
    %c0_1 = arith.constant 0 : index
    %0 = vector.load %arg1[%c0, %c0_0, %c0_1] : memref<8x12x256xbf16, #tpu.memory_space<vmem>>, vector<8x12x256xbf16>
    %1 = vector.extract_strided_slice %0 {offsets = [0, 0, 0], sizes = [8, 8, 256], strides = [1, 1, 1]} : vector<8x12x256xbf16> to vector<8x8x256xbf16>
    %2 = vector.shape_cast %1 : vector<8x8x256xbf16> to vector<64x256xbf16>
    %c0_2 = arith.constant 0 : index
    %c0_3 = arith.constant 0 : index
    %c0_4 = arith.constant 0 : index
    %3 = vector.load %arg2[%c0_2, %c0_3, %c0_4] : memref<5x256x144xbf16, #tpu.memory_space<vmem>>, vector<1x256x144xbf16>
    %4 = vector.shape_cast %3 : vector<1x256x144xbf16> to vector<256x144xbf16>
    %cst = arith.constant dense<0.000000e+00> : vector<64x144xf32>
    %5 = tpu.matmul %2, %4, %cst {dimension_numbers = #tpu.dot_dimension_numbers<[1], [0], [0], [1], [0, 0, 1, 1], [], []>} : vector<64x256xbf16>, vector<256x144xbf16>, vector<64x144xf32> -> vector<64x144xf32>
    %6 = vector.extract_strided_slice %0 {offsets = [0, 1, 0], sizes = [8, 8, 256], strides = [1, 1, 1]} : vector<8x12x256xbf16> to vector<8x8x256xbf16>
    %7 = vector.shape_cast %6 : vector<8x8x256xbf16> to vector<64x256xbf16>
    %c1 = arith.constant 1 : index
    %c0_5 = arith.constant 0 : index
    %c0_6 = arith.constant 0 : index
    %8 = vector.load %arg2[%c1, %c0_5, %c0_6] : memref<5x256x144xbf16, #tpu.memory_space<vmem>>, vector<1x256x144xbf16>
    %9 = vector.shape_cast %8 : vector<1x256x144xbf16> to vector<256x144xbf16>
    %cst_7 = arith.constant dense<0.000000e+00> : vector<64x144xf32>
    %10 = tpu.matmul %7, %9, %cst_7 {dimension_numbers = #tpu.dot_dimension_numbers<[1], [0], [0], [1], [0, 0, 1, 1], [], []>} : vector<64x256xbf16>, vector<256x144xbf16>, vector<64x144xf32> -> vector<64x144xf32>
    %11 = arith.addf %5, %10 : vector<64x144xf32>
    %12 = vector.extract_strided_slice %0 {offsets = [0, 2, 0], sizes = [8, 8, 256], strides = [1, 1, 1]} : vector<8x12x256xbf16> to vector<8x8x256xbf16>
    %13 = vector.shape_cast %12 : vector<8x8x256xbf16> to vector<64x256xbf16>
    %c2 = arith.constant 2 : index
    %c0_8 = arith.constant 0 : index
    %c0_9 = arith.constant 0 : index
    %14 = vector.load %arg2[%c2, %c0_8, %c0_9] : memref<5x256x144xbf16, #tpu.memory_space<vmem>>, vector<1x256x144xbf16>
    %15 = vector.shape_cast %14 : vector<1x256x144xbf16> to vector<256x144xbf16>
    %cst_10 = arith.constant dense<0.000000e+00> : vector<64x144xf32>
    %16 = tpu.matmul %13, %15, %cst_10 {dimension_numbers = #tpu.dot_dimension_numbers<[1], [0], [0], [1], [0, 0, 1, 1], [], []>} : vector<64x256xbf16>, vector<256x144xbf16>, vector<64x144xf32> -> vector<64x144xf32>
    %17 = arith.addf %11, %16 : vector<64x144xf32>
    %18 = vector.extract_strided_slice %0 {offsets = [0, 3, 0], sizes = [8, 8, 256], strides = [1, 1, 1]} : vector<8x12x256xbf16> to vector<8x8x256xbf16>
    %19 = vector.shape_cast %18 : vector<8x8x256xbf16> to vector<64x256xbf16>
    %c3 = arith.constant 3 : index
    %c0_11 = arith.constant 0 : index
    %c0_12 = arith.constant 0 : index
    %20 = vector.load %arg2[%c3, %c0_11, %c0_12] : memref<5x256x144xbf16, #tpu.memory_space<vmem>>, vector<1x256x144xbf16>
    %21 = vector.shape_cast %20 : vector<1x256x144xbf16> to vector<256x144xbf16>
    %cst_13 = arith.constant dense<0.000000e+00> : vector<64x144xf32>
    %22 = tpu.matmul %19, %21, %cst_13 {dimension_numbers = #tpu.dot_dimension_numbers<[1], [0], [0], [1], [0, 0, 1, 1], [], []>} : vector<64x256xbf16>, vector<256x144xbf16>, vector<64x144xf32> -> vector<64x144xf32>
    %23 = arith.addf %17, %22 : vector<64x144xf32>
    %24 = vector.extract_strided_slice %0 {offsets = [0, 4, 0], sizes = [8, 8, 256], strides = [1, 1, 1]} : vector<8x12x256xbf16> to vector<8x8x256xbf16>
    %25 = vector.shape_cast %24 : vector<8x8x256xbf16> to vector<64x256xbf16>
    %c4 = arith.constant 4 : index
    %c0_14 = arith.constant 0 : index
    %c0_15 = arith.constant 0 : index
    %26 = vector.load %arg2[%c4, %c0_14, %c0_15] : memref<5x256x144xbf16, #tpu.memory_space<vmem>>, vector<1x256x144xbf16>
    %27 = vector.shape_cast %26 : vector<1x256x144xbf16> to vector<256x144xbf16>
    %cst_16 = arith.constant dense<0.000000e+00> : vector<64x144xf32>
    %28 = tpu.matmul %25, %27, %cst_16 {dimension_numbers = #tpu.dot_dimension_numbers<[1], [0], [0], [1], [0, 0, 1, 1], [], []>} : vector<64x256xbf16>, vector<256x144xbf16>, vector<64x144xf32> -> vector<64x144xf32>
    %29 = arith.addf %23, %28 : vector<64x144xf32>
    %c0_17 = arith.constant 0 : index
    %c0_18 = arith.constant 0 : index
    %30 = vector.load %arg3[%c0_17, %c0_18] : memref<1x144xf32, #tpu.memory_space<vmem>>, vector<1x144xf32>
    %31 = vector.broadcast %30 : vector<1x144xf32> to vector<64x144xf32>
    %32 = arith.addf %29, %31 : vector<64x144xf32>
    %cst_19 = arith.constant 0.000000e+00 : f32
    %33 = vector.broadcast %cst_19 : f32 to vector<64x144xf32>
    %34 = arith.maximumf %32, %33 : vector<64x144xf32>
    %35 = vector.shape_cast %34 : vector<64x144xf32> to vector<8x8x144xf32>
    %c0_20 = arith.constant 0 : index
    %c0_21 = arith.constant 0 : index
    %36 = vector.load %arg4[%c0_20, %c0_21] : memref<8x144xf32, #tpu.memory_space<vmem>>, vector<8x144xf32>
    %37 = vector.shape_cast %36 : vector<8x144xf32> to vector<1x8x144xf32>
    %38 = vector.broadcast %37 : vector<1x8x144xf32> to vector<8x8x144xf32>
    %39 = arith.addf %35, %38 : vector<8x8x144xf32>
    %cst_22 = arith.constant dense<0xFF800000> : vector<8x144xf32>
    %40 = vector.multi_reduction <maximumf>, %39, %cst_22 [1] : vector<8x8x144xf32> to vector<8x144xf32>
    %c0_23 = arith.constant 0 : index
    %c0_24 = arith.constant 0 : index
    %41 = vector.load %arg5[%c0_23, %c0_24] : memref<144x128xf32, #tpu.memory_space<vmem>>, vector<144x128xf32>
    %cst_25 = arith.constant dense<0.000000e+00> : vector<8x128xf32>
    %42 = tpu.matmul %40, %41, %cst_25 {dimension_numbers = #tpu.dot_dimension_numbers<[1], [0], [0], [1], [0, 0, 1, 1], [], []>} : vector<8x144xf32>, vector<144x128xf32>, vector<8x128xf32> -> vector<8x128xf32>
    %c0_26 = arith.constant 0 : index
    %c0_27 = arith.constant 0 : index
    %43 = vector.load %arg6[%c0_26, %c0_27] : memref<1x128xf32, #tpu.memory_space<vmem>>, vector<1x128xf32>
    %44 = vector.broadcast %43 : vector<1x128xf32> to vector<8x128xf32>
    %45 = arith.addf %42, %44 : vector<8x128xf32>
    %c0_28 = arith.constant 0 : index
    %c0_29 = arith.constant 0 : index
    %46 = vector.load %arg7[%c0_28, %c0_29] : memref<8x128xf32, #tpu.memory_space<vmem>>, vector<8x128xf32>
    tpu.vector_store %arg7[%c0_28, %c0_29], %45 {strides = array<i32>} : memref<8x128xf32, #tpu.memory_space<vmem>>, vector<8x128xf32>,
    return
  }
  func.func @transform_0(%arg0: i32) -> (i32, i32, i32) {
    %c0_i32 = arith.constant 0 : i32
    %c0_i32_0 = arith.constant 0 : i32
    %c0_i32_1 = arith.constant 0 : i32
    return %arg0, %c0_i32, %c0_i32_0 : i32, i32, i32
  }
  func.func @transform_1(%arg0: i32) -> (i32, i32, i32) {
    %c0_i32 = arith.constant 0 : i32
    %c0_i32_0 = arith.constant 0 : i32
    %c0_i32_1 = arith.constant 0 : i32
    %c0_i32_2 = arith.constant 0 : i32
    return %c0_i32, %c0_i32_0, %c0_i32_1 : i32, i32, i32
  }
  func.func @transform_2(%arg0: i32) -> (i32, i32) {
    %c0_i32 = arith.constant 0 : i32
    %c0_i32_0 = arith.constant 0 : i32
    %c0_i32_1 = arith.constant 0 : i32
    return %c0_i32, %c0_i32_0 : i32, i32
  }
  func.func @transform_3(%arg0: i32) -> (i32, i32) {
    %c0_i32 = arith.constant 0 : i32
    %c0_i32_0 = arith.constant 0 : i32
    %c0_i32_1 = arith.constant 0 : i32
    return %c0_i32, %c0_i32_0 : i32, i32
  }
  func.func @transform_4(%arg0: i32) -> (i32, i32) {
    %c0_i32 = arith.constant 0 : i32
    %c0_i32_0 = arith.constant 0 : i32
    %c0_i32_1 = arith.constant 0 : i32
    return %c0_i32, %c0_i32_0 : i32, i32
  }
  func.func @transform_5(%arg0: i32) -> (i32, i32) {
    %c0_i32 = arith.constant 0 : i32
    %c0_i32_0 = arith.constant 0 : i32
    %c0_i32_1 = arith.constant 0 : i32
    return %c0_i32, %c0_i32_0 : i32, i32
  }
  func.func @transform_6(%arg0: i32) -> (i32, i32) {
    %c0_i32 = arith.constant 0 : i32
    %c0_i32_0 = arith.constant 0 : i32
    return %arg0, %c0_i32 : i32, i32
  }
}

</mosaic_0001>

<bundles_post_ra>
// kernel: cnn_text_forward.1
= control target key start
LH: loop header
LB: loop body
LE: loop exit
PB: predicated region body
PF: predicated region fallthrough
CT: control target
= control target key end

     0   :  { %vm71_vm0 = vsmask.f32 3328  ;;  %vm72_vm1 = vsmask.f32 7440  ;;  %vm1511_vm3 = vcmask 1041408   ;;  %vm1512_vm4 = vcmask 1045508   ;;  %s4030_s1 = inlined_call_operand.vmem [shape: bf16[5,256,144], index: 1, kind: input, shape index: {}]   ;;  %s4031_s0 = inlined_call_operand.vmem [shape: bf16[8,12,256], index: 0, kind: input, shape index: {}]   ;;  %s4032_s4 = inlined_call_operand.vmem [shape: f32[144,128], index: 4, kind: input, shape index: {}]   ;;  %s4033_s2 = inlined_call_operand.vmem [shape: f32[1,144], index: 2, kind: input, shape index: {}]   ;;  %s4034_s3 = inlined_call_operand.vmem [shape: f32[8,144], index: 3, kind: input, shape index: {}]   ;;  %s4035_s5 = inlined_call_operand.vmem [shape: f32[1,128], index: 5, kind: input, shape index: {}]   ;;  %s4036_s6 = inlined_call_operand.vmem [shape: f32[8,128], index: 6, kind: output, shape index: {}]  }
   0x1   :  { %v2514_v0 = vld [vmem:[%s4030_s1 + $0x174] ss:$8 sps:$4 sm:$0xff]   ;;  %v2518_v2 = vld [vmem:[%s4030_s1 + $0x170] ss:$8 sps:$4 sm:$0xff]   ;;  %v2520_v4 = vld [vmem:[%s4030_s1 + $0x164] ss:$8 sps:$4 sm:$0xff]  }
   0x2   :  { %v2516_v1 = vld [vmem:[%s4030_s1 + $0x74] ss:$8 sps:$4 sm:$0xff]   ;;  %411 = vmatprep.subr.bf16.mxu0 %v2514_v0  ;;  %v2519_v3 = vld [vmem:[%s4030_s1 + $0x70] ss:$8 sps:$4 sm:$0xff]   ;;  %v2522_v5 = vld [vmem:[%s4030_s1 + $0x64] ss:$8 sps:$4 sm:$0xff]  }
   0x3   :  { %684 = vmatprep.subr.bf16.mxu1 %v2516_v1  ;;  %412 = vmatpush1.bf16.msra.mxu0 %v2518_v2  ;;  %v2524_v6 = vld [vmem:[%s4030_s1 + $0x160] ss:$8 sps:$4 sm:$0xff]   ;;  %v2526_v8 = vld [vmem:[%s4030_s1 + $0x154] ss:$8 sps:$4 sm:$0xff]   ;;  %v2530_v10 = vld [vmem:[%s4030_s1 + $0x150] ss:$8 sps:$4 sm:$0xff]  }
   0x4   :  { %685 = vmatpush1.bf16.msra.mxu1 %v2519_v3  ;;  %413 = vmatprep.subr.bf16.mxu0 %v2520_v4  ;;  %v2525_v7 = vld [vmem:[%s4030_s1 + $0x60] ss:$8 sps:$4 sm:$0xff]   ;;  %v2528_v9 = vld [vmem:[%s4030_s1 + $0x54] ss:$8 sps:$4 sm:$0xff]   ;;  %v2531_v11 = vld [vmem:[%s4030_s1 + $0x50] ss:$8 sps:$4 sm:$0xff]  }
   0x5   :  { %686 = vmatprep.subr.bf16.mxu1 %v2522_v5  ;;  %v2532_v12 = vld [vmem:[%s4030_s1 + $0x144] ss:$8 sps:$4 sm:$0xff]   ;;  %v2536_v14 = vld [vmem:[%s4030_s1 + $0x140] ss:$8 sps:$4 sm:$0xff]   ;;  %v2538_v16 = vld [vmem:[%s4030_s1 + $0x134] ss:$8 sps:$4 sm:$0xff]  }
   0x6   :  { %v2534_v13 = vld [vmem:[%s4030_s1 + $0x44] ss:$8 sps:$4 sm:$0xff]   ;;  %v2537_v15 = vld [vmem:[%s4030_s1 + $0x40] ss:$8 sps:$4 sm:$0xff]   ;;  %v2540_v17 = vld [vmem:[%s4030_s1 + $0x34] ss:$8 sps:$4 sm:$0xff]  }
   0x7   :  { %414 = vmatpush1.bf16.msra.mxu0 %v2524_v6  ;;  %v2542_v18 = vld [vmem:[%s4030_s1 + $0x130] ss:$8 sps:$4 sm:$0xff]   ;;  %v2544_v20 = vld [vmem:[%s4030_s1 + $0x124] ss:$8 sps:$4 sm:$0xff]   ;;  %v2548_v22 = vld [vmem:[%s4030_s1 + $0x120] ss:$8 sps:$4 sm:$0xff]  }
   0x8   :  { %687 = vmatpush1.bf16.msra.mxu1 %v2525_v7  ;;  %415 = vmatprep.subr.bf16.mxu0 %v2526_v8  ;;  %v2543_v19 = vld [vmem:[%s4030_s1 + $0x30] ss:$8 sps:$4 sm:$0xff]   ;;  %v2546_v21 = vld [vmem:[%s4030_s1 + $0x24] ss:$8 sps:$4 sm:$0xff]   ;;  %v2549_v23 = vld [vmem:[%s4030_s1 + $0x20] ss:$8 sps:$4 sm:$0xff]  }
   0x9   :  { %688 = vmatprep.subr.bf16.mxu1 %v2528_v9  ;;  %v2550_v24 = vld [vmem:[%s4030_s1 + $0x114] ss:$8 sps:$4 sm:$0xff]   ;;  %v2554_v26 = vld [vmem:[%s4030_s1 + $0x110] ss:$8 sps:$4 sm:$0xff]   ;;  %v2556_v28 = vld [vmem:[%s4030_s1 + $0x104] ss:$8 sps:$4 sm:$0xff]  }
   0xa   :  { %v2552_v25 = vld [vmem:[%s4030_s1 + $0x14] ss:$8 sps:$4 sm:$0xff]   ;;  %v2555_v27 = vld [vmem:[%s4030_s1 + $0x10] ss:$8 sps:$4 sm:$0xff]   ;;  %v2558_v29 = vld [vmem:[%s4030_s1 + $0x4] ss:$8 sps:$4 sm:$0xff]  }
   0xb   :  { %416 = vmatpush1.bf16.msra.mxu0 %v2530_v10  ;;  %v2560_v30 = vld [vmem:[%s4030_s1 + $0x100] ss:$8 sps:$4 sm:$0xff]   ;;  %v2562_v32 = vld [vmem:[%s4030_s1 + $0x1f4] ss:$8 sps:$4 sm:$0xff]   ;;  %v2566_v34 = vld [vmem:[%s4030_s1 + $0x1f0] ss:$8 sps:$4 sm:$0xff]  }
   0xc   :  { %689 = vmatpush1.bf16.msra.mxu1 %v2531_v11  ;;  %417 = vmatprep.subr.bf16.mxu0 %v2532_v12  ;;  %v2561_v31 = vld [vmem:[%s4030_s1] ss:$8 sps:$4 sm:$0xff]   ;;  %v2564_v33 = vld [vmem:[%s4030_s1 + $0xf4] ss:$8 sps:$4 sm:$0xff]   ;;  %v2567_v35 = vld [vmem:[%s4030_s1 + $0xf0] ss:$8 sps:$4 sm:$0xff]  }
   0xd   :  { %690 = vmatprep.subr.bf16.mxu1 %v2534_v13  ;;  %v2568_v36 = vld [vmem:[%s4030_s1 + $0x1e4] ss:$8 sps:$4 sm:$0xff]   ;;  %v2572_v38 = vld [vmem:[%s4030_s1 + $0x1e0] ss:$8 sps:$4 sm:$0xff]   ;;  %v2574_v40 = vld [vmem:[%s4030_s1 + $0x1d4] ss:$8 sps:$4 sm:$0xff]  }
   0xe   :  { %v2570_v37 = vld [vmem:[%s4030_s1 + $0xe4] ss:$8 sps:$4 sm:$0xff]   ;;  %v2573_v39 = vld [vmem:[%s4030_s1 + $0xe0] ss:$8 sps:$4 sm:$0xff]   ;;  %v2576_v41 = vld [vmem:[%s4030_s1 + $0xd4] ss:$8 sps:$4 sm:$0xff]  }
   0xf   :  { %418 = vmatpush1.bf16.msra.mxu0 %v2536_v14  ;;  %v2578_v42 = vld [vmem:[%s4030_s1 + $0x1d0] ss:$8 sps:$4 sm:$0xff]   ;;  %v2580_v44 = vld [vmem:[%s4030_s1 + $0x1c4] ss:$8 sps:$4 sm:$0xff]   ;;  %v2584_v46 = vld [vmem:[%s4030_s1 + $0x1c0] ss:$8 sps:$4 sm:$0xff]  }
  0x10   :  { %691 = vmatpush1.bf16.msra.mxu1 %v2537_v15  ;;  %419 = vmatprep.subr.bf16.mxu0 %v2538_v16  ;;  %v2579_v43 = vld [vmem:[%s4030_s1 + $0xd0] ss:$8 sps:$4 sm:$0xff]   ;;  %v2582_v45 = vld [vmem:[%s4030_s1 + $0xc4] ss:$8 sps:$4 sm:$0xff]   ;;  %v2585_v47 = vld [vmem:[%s4030_s1 + $0xc0] ss:$8 sps:$4 sm:$0xff]  }
  0x11   :  { %692 = vmatprep.subr.bf16.mxu1 %v2540_v17  ;;  %v2945_v48 = vld [vmem:[%s4031_s0] sm:$0xff]  ;;  %v2950_v49 = vld [vmem:[%s4031_s0 + $0x8] sm:$0x33]  ;;  %v2955_v50 = vld [vmem:[%s4031_s0 + $0x10] sm:$0xff]  ;;  %vm1114_vm6 = vsmask.f32 2304 }
  0x12   :  { %v2960_v51 = vld [vmem:[%s4031_s0 + $0x18] sm:$0x33]  ;;  %v75_v52 = vshrl.u32 %v2945_v48, 16  ;;  %v78_v53 = vshll.u32 %v2945_v48, 16  ;;  %v84_v54 = vshll.u32 %v2950_v49, 16  ;;  %v89_v55 = vshrl.u32 %v2955_v50, 16  ;;  %vm2998_vm2 = vmor %vm71_vm0, %vm72_vm1 }
  0x13   :  { %420 = vmatpush1.bf16.msra.mxu0 %v2542_v18  ;;  %v92_v56 = vshll.u32 %v2955_v50, 16  ;;  %v2586_v57 = vld [vmem:[%s4030_s1 + $0x1b4] ss:$8 sps:$4 sm:$0xff]   ;;  %v98_v60 = vshll.u32 %v2960_v51, 16  ;;  %v2240_v61 = vcombine.high %v2945_v48, %v2955_v50  ;;  %v2590_v62 = vld [vmem:[%s4030_s1 + $0x1b0] ss:$8 sps:$4 sm:$0xff]   ;;  %vm3116_vm5 = vmor %vm1511_vm3, %vm1512_vm4 }
  0x14   :  { %693 = vmatpush1.bf16.msra.mxu1 %v2543_v19  ;;  %421 = vmatprep.subr.bf16.mxu0 %v2544_v20  ;;  %v2588_v58 = vld [vmem:[%s4030_s1 + $0xb4] ss:$8 sps:$4 sm:$0xff]   ;;  %v77_v59 = vrot.slane %v75_v52, 4  ;;  %v80_v63 = vrot.slane %v78_v53, 5  ;;  %v91_v0 = vrot.slane %v89_v55, 4  ;;  %v86_v6 = vrot.slane %v84_v54, 5 }
  0x15   :  { %694 = vmatprep.subr.bf16.mxu1 %v2546_v21  ;;  %v94_v1 = vrot.slane %v92_v56, 5  ;;  %v2591_v2 = vld [vmem:[%s4030_s1 + $0xb0] ss:$8 sps:$4 sm:$0xff]   ;;  %v2592_v3 = vld [vmem:[%s4030_s1 + $0x1a4] ss:$8 sps:$4 sm:$0xff]   ;;  %716 = vmatprep.mubr.bf16.mxu1 %v2240_v61  ;;  %v100_v8 = vrot.slane %v98_v60, 5 }
  0x16   :  { %v2594_v4 = vld [vmem:[%s4030_s1 + $0xa4] ss:$8 sps:$4 sm:$0xff]   ;;  %v81_v5 = vor.u32 %v80_v63, %v77_v59  ;;  %v2596_v12 = vld [vmem:[%s4030_s1 + $0x1a0] ss:$8 sps:$4 sm:$0xff]   ;;  %v2598_v16 = vld [vmem:[%s4030_s1 + $0x194] ss:$8 sps:$4 sm:$0xff]  }
  0x17   :  { %422 = vmatpush1.bf16.msra.mxu0 %v2548_v22  ;;  %v95_v7 = vor.u32 %v94_v1, %v91_v0  ;;  %v2597_v13 = vld [vmem:[%s4030_s1 + $0xa0] ss:$8 sps:$4 sm:$0xff]   ;;  %v2600_v17 = vld [vmem:[%s4030_s1 + $0x94] ss:$8 sps:$4 sm:$0xff]   ;;  %v2602_v19 = vld [vmem:[%s4030_s1 + $0x190] ss:$8 sps:$4 sm:$0xff]  }
  0x18   :  { %695 = vmatpush1.bf16.msra.mxu1 %v2549_v23  ;;  %423 = vmatprep.subr.bf16.mxu0 %v2550_v24  ;;  %v82_v10 = vrot.slane %v81_v5, 4  ;;  %v2603_v20 = vld [vmem:[%s4030_s1 + $0x90] ss:$8 sps:$4 sm:$0xff]   ;;  %v2604_v21 = vld [vmem:[%s4030_s1 + $0x184] ss:$8 sps:$4 sm:$0xff]   ;;  %vm765_vm8 = vcmask 1042432  }
  0x19   :  { %696 = vmatprep.subr.bf16.mxu1 %v2552_v25  ;;  %v96_v11 = vrot.slane %v95_v7, 4  ;;  %v2606_v22 = vld [vmem:[%s4030_s1 + $0x84] ss:$8 sps:$4 sm:$0xff]   ;;  %v2608_v23 = vld [vmem:[%s4030_s1 + $0x180] ss:$8 sps:$4 sm:$0xff]   ;;  %vm766_vm9 = vcmask 1046532  }
  0x1a   :  { %v87_v14 = vsel %vm2998_vm2, %v82_v10, %v86_v6  ;;  %v2609_v24 = vld [vmem:[%s4030_s1 + $0x80] ss:$8 sps:$4 sm:$0xff]   ;;  %v2614_v25 = vld [vmem:[%s4030_s1 + $0x274] ss:$8 sps:$4 sm:$0xff]   ;;  %vm1115_vm7 = vsmask.f32 6416  ;;  %vm3337_vm11 = vmor %vm765_vm8, %vm766_vm9 }
  0x1b   :  { %424 = vmatpush1.bf16.msra.mxu0 %v2554_v26  ;;  %v101_v15 = vsel %vm2998_vm2, %v96_v11, %v100_v8  ;;  %v2617_v26 = vld [vmem:[%s4030_s1 + $0x374] ss:$8 sps:$4 sm:$0xff]   ;;  %v2632_v8 = vld [vmem:[%s4030_s1 + $0x244] ss:$8 sps:$4 sm:$0xff]   ;;  %vm3289_vm10 = vmor %vm1114_vm6, %vm1115_vm7  ;;  %vm1928_vm12 = vcmask 130048   ;;  %vm2068_vm13 = vcmask 1041409  }
  0x1c   :  { %697 = vmatpush1.bf16.msra.mxu1 %v2555_v27  ;;  %425 = vmatprep.subr.bf16.mxu0 %v2556_v28  ;;  %v2200_v18 = vcombine.high %v87_v14, %v101_v15  ;;  %v2612_v27 = vld [vmem:[%s4030_s1 + $0x270] ss:$8 sps:$4 sm:$0xff]   ;;  %v2199_v28 = vcombine.low %v87_v14, %v101_v15  ;;  %v2635_v14 = vld [vmem:[%s4030_s1 + $0x344] ss:$8 sps:$4 sm:$0xff]   ;;  %vm2070_vm14 = vcmask 1042434   ;;  %vm2072_vm15 = vcmask 1043459  }
  0x1d   :  { %698 = vmatprep.subr.bf16.mxu1 %v2558_v29  ;;  %v2239_v29 = vcombine.low %v2945_v48, %v2955_v50  ;;  %vm2074_vm0 = vcmask 1044484   ;;  %vm2076_vm1 = vcmask 1045509   ;;  %vm2080_vm3 = vcmask 1047559  }
  0x1e   :  { %443 = vmatprep.mubr.bf16.mxu0 %v2200_v18 }
  0x1f   :  { %426 = vmatpush1.bf16.msra.mxu0 %v2560_v30  ;;  %v2615_v30 = vld [vmem:[%s4030_s1 + $0x370] ss:$8 sps:$4 sm:$0xff]  }
  0x20   :  { %699 = vmatpush1.bf16.msra.mxu1 %v2561_v31  ;;  %427 = vmatprep.subr.bf16.mxu0 %v2562_v32  ;;  %v3050_v31 = vrot.slane %v84_v54, 6  ;;  %v3052_v32 = vrot.slane %v98_v60, 6  ;;  %v1520_v54 = vrot.slane %v2960_v51, 6 }
  0x21   :  { %700 = vmatprep.subr.bf16.mxu1 %v2564_v33  ;;  %v2620_v33 = vld [vmem:[%s4030_s1 + $0x264] ss:$8 sps:$4 sm:$0xff]  }
  0x23   :  { %428 = vmatpush2.bf16.msra.mxu0 %v2566_v34  ;;  %v2623_v34 = vld [vmem:[%s4030_s1 + $0x364] ss:$8 sps:$4 sm:$0xff]  }
  0x24   :  { %701 = vmatpush2.bf16.msra.mxu1 %v2567_v35  ;;  %429 = vmatprep.subr.bf16.mxu0 %v2568_v36  ;;  %v2279_v35 = vrot.slane %v2945_v48, 9  ;;  %v770_v36 = vrot.slane %v2950_v49, 5 }
  0x25   :  { %702 = vmatprep.subr.bf16.mxu1 %v2570_v37  ;;  %v3064_v37 = vrot.slane %v75_v52, 5  ;;  %v1516_v52 = vrot.slane %v2950_v49, 6 }
  0x27   :  { %430 = vmatpush2.bf16.msra.mxu0 %v2572_v38  ;;  %v2618_v38 = vld [vmem:[%s4030_s1 + $0x260] ss:$8 sps:$4 sm:$0xff]  }
  0x28   :  { %703 = vmatpush2.bf16.msra.mxu1 %v2573_v39  ;;  %431 = vmatprep.subr.bf16.mxu0 %v2574_v40  ;;  %v2621_v39 = vld [vmem:[%s4030_s1 + $0x360] ss:$8 sps:$4 sm:$0xff]   ;;  %v3074_v40 = vrot.slane %v78_v53, 6  ;;  %v2432_v53 = vrot.slane %v2955_v50, 10 }
  0x29   :  { %704 = vmatprep.subr.bf16.mxu1 %v2576_v41  ;;  %v1121_v41 = vshrl.u32 %v2950_v49, 16 }
  0x2a   :  { %v3162_v18 = vsel %vm3116_vm5, %v2432_v53, %v1520_v54  ;;  %v2636_v53 = vld [vmem:[%s4030_s1 + $0x230] ss:$8 sps:$4 sm:$0xff]  }
  0x2b   :  { %432 = vmatpush2.bf16.msra.mxu0 %v2578_v42  ;;  %v2626_v42 = vld [vmem:[%s4030_s1 + $0x254] ss:$8 sps:$4 sm:$0xff]   ;;  %v3137_v7 = vrot.slane %v1121_v41, 5 }
  0x2c   :  { %705 = vmatpush2.bf16.msra.mxu1 %v2579_v43  ;;  %433 = vmatprep.subr.bf16.mxu0 %v2580_v44  ;;  %v2629_v43 = vld [vmem:[%s4030_s1 + $0x354] ss:$8 sps:$4 sm:$0xff]   ;;  %v3085_v44 = vrot.slane %v89_v55, 5 }
  0x2d   :  { %706 = vmatprep.subr.bf16.mxu1 %v2582_v45  ;;  %v2431_v45 = vrot.slane %v2945_v48, 10  ;;  %v3104_v55 = vld [vmem:[%s4031_s0 + $0x30] sm:$0xff]  ;;  %v2673_v48 = vld [vmem:[%s4030_s1 + $0x3e4] ss:$8 sps:$4 sm:$0xff]  }
  0x2e   :  { %v117_v63 = vshrl.u32 %v3104_v55, 16  ;;  %v120_v0 = vshll.u32 %v3104_v55, 16 }
  0x2f   :  { %434 = vmatpush2.bf16.msra.mxu0 %v2584_v46  ;;  %v3091_v46 = vld [vmem:[%s4031_s0 + $0x20] sm:$0xff] }
  0x30   :  { %707 = vmatpush2.bf16.msra.mxu1 %v2585_v47  ;;  %435 = vmatprep.subr.bf16.mxu0 %v2586_v57  ;;  %v3096_v47 = vld [vmem:[%s4031_s0 + $0x28] sm:$0x33]  ;;  %v3109_v57 = vld [vmem:[%s4031_s0 + $0x38] sm:$0x33]  ;;  %v106_v59 = vshll.u32 %v3091_v46, 16  ;;  %v2241_v6 = vcombine.low %v3091_v46, %v3104_v55  ;;  %v119_v10 = vrot.slane %v117_v63, 4 }
  0x31   :  { %708 = vmatprep.subr.bf16.mxu1 %v2588_v58  ;;  %v103_v58 = vshrl.u32 %v3091_v46, 16  ;;  %v112_v60 = vshll.u32 %v3096_v47, 16  ;;  %v126_v1 = vshll.u32 %v3109_v57, 16  ;;  %v122_v11 = vrot.slane %v120_v0, 5 }
  0x32   :  { %v108_v5 = vrot.slane %v106_v59, 5 }
  0x33   :  { %436 = vmatpush2.bf16.msra.mxu0 %v2590_v62  ;;  %v2624_v62 = vld [vmem:[%s4030_s1 + $0x250] ss:$8 sps:$4 sm:$0xff]  }
  0x34   :  { %709 = vmatpush2.bf16.msra.mxu1 %v2591_v2  ;;  %437 = vmatprep.subr.bf16.mxu0 %v2592_v3  ;;  %v2242_v2 = vcombine.high %v3091_v46, %v3104_v55  ;;  %v2627_v3 = vld [vmem:[%s4030_s1 + $0x350] ss:$8 sps:$4 sm:$0xff]  }
  0x35   :  { %710 = vmatprep.subr.bf16.mxu1 %v2594_v4  ;;  %v105_v4 = vrot.slane %v103_v58, 4 }
  0x37   :  { %438 = vmatpush2.bf16.msra.mxu0 %v2596_v12  ;;  %v1131_v12 = vshrl.u32 %v2960_v51, 16  ;;  %v109_v15 = vor.u32 %v108_v5, %v105_v4  ;;  %v2639_v4 = vld [vmem:[%s4030_s1 + $0x330] ss:$8 sps:$4 sm:$0xff]   ;;  %v2644_v5 = vld [vmem:[%s4030_s1 + $0x224] ss:$8 sps:$4 sm:$0xff]  }
  0x38   :  { %711 = vmatpush2.bf16.msra.mxu1 %v2597_v13  ;;  %439 = vmatprep.subr.bf16.mxu0 %v2598_v16  ;;  %v3149_v13 = vsel %vm3116_vm5, %v2431_v45, %v1516_v52  ;;  %v114_v16 = vrot.slane %v112_v60, 5 }
  0x39   :  { %712 = vmatprep.subr.bf16.mxu1 %v2600_v17  ;;  %v3158_v17 = vrot.slane %v92_v56, 6  ;;  %v2471_v56 = vcombine.low %v3149_v13, %v3162_v18 }
  0x3b   :  { %440 = vmatpush2.bf16.msra.mxu0 %v2602_v19  ;;  %v2630_v19 = vld [vmem:[%s4030_s1 + $0x240] ss:$8 sps:$4 sm:$0xff]  }
  0x3c   :  { %713 = vmatpush2.bf16.msra.mxu1 %v2603_v20  ;;  %441 = vmatprep.subr.bf16.mxu0 %v2604_v21  ;;  %v2633_v20 = vld [vmem:[%s4030_s1 + $0x340] ss:$8 sps:$4 sm:$0xff]   ;;  %v123_v21 = vor.u32 %v122_v11, %v119_v10  ;;  %v1129_v10 = vor.u32 %v3158_v17, %v3085_v44  ;;  %v2647_v11 = vld [vmem:[%s4030_s1 + $0x324] ss:$8 sps:$4 sm:$0xff]  }
  0x3d   :  { %714 = vmatprep.subr.bf16.mxu1 %v2606_v22  ;;  %v128_v22 = vrot.slane %v126_v1, 5  ;;  %v2645_v44 = vld [vmem:[%s4030_s1 + $0x320] ss:$8 sps:$4 sm:$0xff]  }
  0x3f   :  { %442 = vmatpush2.bf16.msra.mxu0 %v2608_v23  ;;  %v2472_v23 = vcombine.high %v3149_v13, %v3162_v18 }
  0x40   :  { %715 = vmatpush2.bf16.msra.mxu1 %v2609_v24  ;;  %1025 = vmatprep.subr.bf16.mxu0 %v2614_v25  ;;  %v2638_v24 = vld [vmem:[%s4030_s1 + $0x234] ss:$8 sps:$4 sm:$0xff]  }
  0x41   :  { %1422 = vmatprep.subr.bf16.mxu1 %v2617_v26  ;;  %v2641_v25 = vld [vmem:[%s4030_s1 + $0x334] ss:$8 sps:$4 sm:$0xff]   ;;  %v110_v26 = vrot.slane %v109_v15, 4 }
  0x42   :  { %444 = vmatmul.mubr.bf16.vlgmr.msra.gmra.mxu0 %v2199_v28  ;;  %v3185_v28 = vld [vmem:[%s4031_s0 + $0x40] sm:$0xff] }
  0x43   :  { %717 = vmatmul.mubr.bf16.vlgmr.msra.gmra.mxu1 %v2239_v29  ;;  %1026 = vmatpush1.bf16.msra.mxu0 %v2612_v27  ;;  %v124_v27 = vrot.slane %v123_v21, 4  ;;  %v3190_v29 = vld [vmem:[%s4031_s0 + $0x48] sm:$0x33]  ;;  %v131_v41 = vshrl.u32 %v3185_v28, 16 }
  0x44   :  { %1423 = vmatpush1.bf16.msra.mxu1 %v2615_v30  ;;  %1027 = vmatprep.subr.bf16.mxu0 %v2620_v33  ;;  %v3195_v30 = vld [vmem:[%s4031_s0 + $0x50] sm:$0xff]  ;;  %v1119_v33 = vor.u32 %v3074_v40, %v3064_v37 }
  0x45   :  { %1424 = vmatprep.subr.bf16.mxu1 %v2623_v34  ;;  %726 = vmatprep.mubr.bf16.mxu1 %v2242_v2  ;;  %v3199_v34 = vrot.slane %v1131_v12, 5  ;;  %v129_v37 = vsel %vm2998_vm2, %v124_v27, %v128_v22  ;;  %v145_v40 = vshrl.u32 %v3195_v30, 16  ;;  %v148_v45 = vshll.u32 %v3195_v30, 16  ;;  %v2650_v22 = vld [vmem:[%s4030_s1 + $0x214] ss:$8 sps:$4 sm:$0xff]   ;;  %v3261_v27 = vld [vmem:[%s4031_s0 + $0x60] sm:$0xff] }
  0x46   :  { %v133_v2 = vrot.slane %v131_v41, 4  ;;  %v2244_v15 = vcombine.high %v3185_v28, %v3195_v30  ;;  %v2243_v21 = vcombine.low %v3185_v28, %v3195_v30 }
  0x47   :  { %1028 = vmatpush1.bf16.msra.mxu0 %v2618_v38  ;;  %v115_v38 = vsel %vm2998_vm2, %v110_v26, %v114_v16  ;;  %v1120_v16 = vrot.slane %v1119_v33, 4  ;;  %v3266_v33 = vld [vmem:[%s4031_s0 + $0x68] sm:$0x33] }
  0x48   :  { %1425 = vmatpush1.bf16.msra.mxu1 %v2621_v39  ;;  %1029 = vmatprep.subr.bf16.mxu0 %v2626_v42  ;;  %v3206_v39 = vld [vmem:[%s4031_s0 + $0x58] sm:$0x33]  ;;  %v134_v42 = vshll.u32 %v3185_v28, 16  ;;  %v2202_v54 = vcombine.high %v115_v38, %v129_v37 }
  0x49   :  { %1426 = vmatprep.subr.bf16.mxu1 %v2629_v43  ;;  %v140_v43 = vshll.u32 %v3190_v29, 16  ;;  %v154_v52 = vshll.u32 %v3206_v39, 16 }
  0x4a   :  { %453 = vmatprep.mubr.bf16.mxu0 %v2202_v54  ;;  %v1135_v54 = vor.u32 %v3052_v32, %v3199_v34  ;;  %v2729_v32 = vld [vmem:[%s4030_s1 + $0x420] ss:$8 sps:$4 sm:$0xff]  }
  0x4b   :  { %727 = vmatmul.mubr.bf16.gmra.mxu1 %v2241_v6  ;;  %1030 = vmatpush1.bf16.msra.mxu0 %v2624_v62  ;;  %v2201_v62 = vcombine.low %v115_v38, %v129_v37  ;;  %v147_v6 = vrot.slane %v145_v40, 4  ;;  %v3271_v38 = vld [vmem:[%s4031_s0 + $0x70] sm:$0xff]  ;;  %v1125_v37 = vor.u32 %v3050_v31, %v3137_v7  ;;  %v168_v31 = vshll.u32 %v3266_v33, 16 }
  0x4c   :  { %1427 = vmatpush1.bf16.msra.mxu1 %v2627_v3  ;;  %1031 = vmatprep.subr.bf16.mxu0 %v2632_v8  ;;  %v136_v3 = vrot.slane %v134_v42, 5  ;;  %v150_v8 = vrot.slane %v148_v45, 5  ;;  %v173_v34 = vshrl.u32 %v3271_v38, 16 }
  0x4d   :  { %1428 = vmatprep.subr.bf16.mxu1 %v2635_v14  ;;  %v142_v14 = vrot.slane %v140_v43, 5  ;;  %454 = vmatmul.mubr.bf16.gmra.mxu0 %v2201_v62 }
  0x4e   :  { %v137_v12 = vor.u32 %v136_v3, %v133_v2  ;;  %v151_v17 = vor.u32 %v150_v8, %v147_v6  ;;  %736 = vmatprep.mubr.bf16.mxu1 %v2244_v15  ;;  %v3282_v2 = vld [vmem:[%s4031_s0 + $0x78] sm:$0x33]  ;;  %v159_v3 = vshrl.u32 %v3261_v27, 16 }
  0x4f   :  { %1032 = vmatpush1.bf16.msra.mxu0 %v2630_v19  ;;  %v2642_v19 = vld [vmem:[%s4030_s1 + $0x220] ss:$8 sps:$4 sm:$0xff]   ;;  %v182_v6 = vshll.u32 %v3282_v2, 16  ;;  %v2648_v8 = vld [vmem:[%s4030_s1 + $0x210] ss:$8 sps:$4 sm:$0xff]  }
  0x50   :  { %1429 = vmatpush1.bf16.msra.mxu1 %v2633_v20  ;;  %1033 = vmatprep.subr.bf16.mxu0 %v2638_v24  ;;  %v156_v20 = vrot.slane %v154_v52, 5  ;;  %v2653_v24 = vld [vmem:[%s4030_s1 + $0x314] ss:$8 sps:$4 sm:$0xff]   ;;  %v152_v26 = vrot.slane %v151_v17, 4  ;;  %v2651_v15 = vld [vmem:[%s4030_s1 + $0x310] ss:$8 sps:$4 sm:$0xff]  }
  0x51   :  { %1430 = vmatprep.subr.bf16.mxu1 %v2641_v25  ;;  %v138_v25 = vrot.slane %v137_v12, 4  ;;  %v161_v12 = vrot.slane %v159_v3, 4  ;;  %v2656_v17 = vld [vmem:[%s4030_s1 + $0x204] ss:$8 sps:$4 sm:$0xff]  }
  0x52   :  { %v157_v7 = vsel %vm2998_vm2, %v152_v26, %v156_v20  ;;  %v175_v20 = vrot.slane %v173_v34, 4 }
  0x53   :  { %1034 = vmatpush1.bf16.msra.mxu0 %v2636_v53  ;;  %v1130_v53 = vrot.slane %v1129_v10, 4  ;;  %v143_v62 = vsel %vm2998_vm2, %v138_v25, %v142_v14  ;;  %737 = vmatmul.mubr.bf16.gmra.mxu1 %v2243_v21  ;;  %v3317_v25 = vsel %vm3289_vm10, %v1120_v16, %v1125_v37  ;;  %v2280_v16 = vrot.slane %v2955_v50, 9  ;;  %v2654_v50 = vld [vmem:[%s4030_s1 + $0x200] ss:$8 sps:$4 sm:$0xff]  }
  0x54   :  { %1431 = vmatpush1.bf16.msra.mxu1 %v2639_v4  ;;  %1035 = vmatprep.subr.bf16.mxu0 %v2644_v5  ;;  %v162_v4 = vshll.u32 %v3261_v27, 16  ;;  %v176_v5 = vshll.u32 %v3271_v38, 16  ;;  %v2204_v10 = vcombine.high %v143_v62, %v157_v7 }
  0x55   :  { %1432 = vmatprep.subr.bf16.mxu1 %v2647_v11  ;;  %v2203_v11 = vcombine.low %v143_v62, %v157_v7  ;;  %v170_v62 = vrot.slane %v168_v31, 5  ;;  %v2246_v7 = vcombine.high %v3261_v27, %v3271_v38 }
  0x56   :  { %v164_v14 = vrot.slane %v162_v4, 5  ;;  %v178_v21 = vrot.slane %v176_v5, 5  ;;  %463 = vmatprep.mubr.bf16.mxu0 %v2204_v10  ;;  %v2657_v10 = vld [vmem:[%s4030_s1 + $0x300] ss:$8 sps:$4 sm:$0xff]  }
  0x57   :  { %1036 = vmatpush1.bf16.msra.mxu0 %v2642_v19  ;;  %v3321_v19 = vsel %vm3289_vm10, %v1130_v53, %v1135_v54  ;;  %v184_v53 = vrot.slane %v182_v6, 5  ;;  %v774_v54 = vrot.slane %v2960_v51, 5  ;;  %746 = vmatprep.mubr.bf16.mxu1 %v2246_v7  ;;  %v2662_v51 = vld [vmem:[%s4030_s1 + $0x2f4] ss:$8 sps:$4 sm:$0xff]   ;;  %v2670_v7 = vld [vmem:[%s4030_s1 + $0x2e4] ss:$8 sps:$4 sm:$0xff]  }
  0x58   :  { %1433 = vmatpush1.bf16.msra.mxu1 %v2645_v44  ;;  %1037 = vmatprep.subr.bf16.mxu0 %v2650_v22  ;;  %v2659_v44 = vld [vmem:[%s4030_s1 + $0x304] ss:$8 sps:$4 sm:$0xff]   ;;  %v165_v26 = vor.u32 %v164_v14, %v161_v12  ;;  %v179_v37 = vor.u32 %v178_v21, %v175_v20  ;;  %v2245_v22 = vcombine.low %v3261_v27, %v3271_v38  ;;  %v2666_v21 = vld [vmem:[%s4030_s1 + $0x3f4] ss:$8 sps:$4 sm:$0xff]  }
  0x59   :  { %1434 = vmatprep.subr.bf16.mxu1 %v2653_v24  ;;  %464 = vmatmul.mubr.bf16.gmra.mxu0 %v2203_v11  ;;  %v2392_v14 = vcombine.high %v3317_v25, %v3321_v19  ;;  %v3376_v9 = vsel %vm3337_vm11, %v2280_v16, %v774_v54  ;;  %v2676_v16 = vld [vmem:[%s4030_s1 + $0x2d4] ss:$8 sps:$4 sm:$0xff]   ;;  %v2684_v54 = vld [vmem:[%s4030_s1 + $0x2c4] ss:$8 sps:$4 sm:$0xff]  }
  0x5a   :  { %v166_v12 = vrot.slane %v165_v26, 4  ;;  %v180_v20 = vrot.slane %v179_v37, 4  ;;  %v2680_v37 = vld [vmem:[%s4030_s1 + $0x3d4] ss:$8 sps:$4 sm:$0xff]   ;;  %v2731_v24 = vld [vmem:[%s4030_s1 + $0x424] ss:$8 sps:$4 sm:$0xff]  }
  0x5b   :  { %1038 = vmatpush1.bf16.msra.mxu0 %v2648_v8  ;;  %747 = vmatmul.mubr.bf16.gmra.mxu1 %v2245_v22  ;;  %v2660_v8 = vld [vmem:[%s4030_s1 + $0x2f0] ss:$8 sps:$4 sm:$0xff]  }
  0x5c   :  { %1435 = vmatpush1.bf16.msra.mxu1 %v2651_v15  ;;  %1039 = vmatprep.subr.bf16.mxu0 %v2656_v17  ;;  %v171_v11 = vsel %vm2998_vm2, %v166_v12, %v170_v62  ;;  %v185_v26 = vsel %vm2998_vm2, %v180_v20, %v184_v53  ;;  %v2664_v15 = vld [vmem:[%s4030_s1 + $0x3f0] ss:$8 sps:$4 sm:$0xff]   ;;  %v3372_v62 = vsel %vm3337_vm11, %v2279_v35, %v770_v36  ;;  %v2668_v35 = vld [vmem:[%s4030_s1 + $0x2e0] ss:$8 sps:$4 sm:$0xff]   ;;  %v1138_v20 = vrot.slane %v106_v59, 6 }
  0x5d   :  { %1436 = vmatprep.subr.bf16.mxu1 %v2659_v44  ;;  %v2206_v17 = vcombine.high %v171_v11, %v185_v26  ;;  %v2205_v44 = vcombine.low %v171_v11, %v185_v26  ;;  %1454 = vmatprep.mubr.bf16.mxu1 %v2392_v14  ;;  %v2320_v49 = vcombine.high %v3372_v62, %v3376_v9  ;;  %v2671_v36 = vld [vmem:[%s4030_s1 + $0x3e0] ss:$8 sps:$4 sm:$0xff]   ;;  %v2674_v53 = vld [vmem:[%s4030_s1 + $0x2d0] ss:$8 sps:$4 sm:$0xff]   ;;  %v2690_v14 = vld [vmem:[%s4030_s1 + $0x2b4] ss:$8 sps:$4 sm:$0xff]  }
  0x5e   :  { %v2678_v22 = vld [vmem:[%s4030_s1 + $0x3d0] ss:$8 sps:$4 sm:$0xff]   ;;  %v2685_v12 = vld [vmem:[%s4030_s1 + $0x3c0] ss:$8 sps:$4 sm:$0xff]   ;;  %v1147_v11 = vrot.slane %v117_v63, 5  ;;  %v1148_v26 = vrot.slane %v120_v0, 6 }
  0x5f   :  { %1040 = vmatpush1.bf16.msra.mxu0 %v2654_v50  ;;  %473 = vmatprep.mubr.bf16.mxu0 %v2206_v17  ;;  %v2687_v50 = vld [vmem:[%s4030_s1 + $0x3c4] ss:$8 sps:$4 sm:$0xff]   ;;  %v2281_v59 = vrot.slane %v3091_v46, 9  ;;  %v3440_v63 = vrot.slane %v112_v60, 6  ;;  %v2692_v0 = vld [vmem:[%s4030_s1 + $0x3b0] ss:$8 sps:$4 sm:$0xff]  }
  0x60   :  { %1437 = vmatpush1.bf16.msra.mxu1 %v2657_v10  ;;  %1041 = vmatprep.subr.bf16.mxu0 %v2662_v51  ;;  %v2682_v10 = vld [vmem:[%s4030_s1 + $0x2c0] ss:$8 sps:$4 sm:$0xff]   ;;  %v1137_v51 = vrot.slane %v103_v58, 5  ;;  %v2694_v58 = vld [vmem:[%s4030_s1 + $0x3b4] ss:$8 sps:$4 sm:$0xff]   ;;  %vm2078_vm2 = vcmask 1046534  }
  0x61   :  { %1438 = vmatprep.subr.bf16.mxu1 %v2666_v21  ;;  %474 = vmatmul.mubr.bf16.gmra.mxu0 %v2205_v44  ;;  %v1141_v21 = vshrl.u32 %v3096_v47, 16  ;;  %v2698_v60 = vld [vmem:[%s4030_s1 + $0x2a4] ss:$8 sps:$4 sm:$0xff]  }
  0x62   :  { %1057 = vmatprep.mubr.bf16.mxu0 %v2320_v49  ;;  %v1139_v17 = vor.u32 %v1138_v20, %v1137_v51  ;;  %v2434_v20 = vrot.slane %v3104_v55, 10 }
  0x63   :  { %1042 = vmatpush2.bf16.msra.mxu0 %v2660_v8  ;;  %v1151_v8 = vshrl.u32 %v3109_v57, 16  ;;  %v3436_v44 = vrot.slane %v1141_v21, 5  ;;  %v1528_v21 = vrot.slane %v3109_v57, 6 }
  0x64   :  { %1439 = vmatpush2.bf16.msra.mxu1 %v2664_v15  ;;  %1043 = vmatprep.subr.bf16.mxu0 %v2670_v7  ;;  %v2688_v15 = vld [vmem:[%s4030_s1 + $0x2b0] ss:$8 sps:$4 sm:$0xff]   ;;  %v778_v7 = vrot.slane %v3096_v47, 5 }
  0x65   :  { %1440 = vmatprep.subr.bf16.mxu1 %v2673_v48  ;;  %v1149_v48 = vor.u32 %v1148_v26, %v1147_v11  ;;  %v3446_v49 = vrot.slane %v1151_v8, 5  ;;  %v2707_v11 = vld [vmem:[%s4030_s1 + $0x394] ss:$8 sps:$4 sm:$0xff]   ;;  %v1157_v26 = vrot.slane %v131_v41, 5  ;;  %v1532_v41 = vrot.slane %v3190_v29, 6 }
  0x67   :  { %1044 = vmatpush2.bf16.msra.mxu0 %v2668_v35  ;;  %v3450_v35 = vrot.slane %v126_v1, 6  ;;  %v2699_v1 = vld [vmem:[%s4030_s1 + $0x3a0] ss:$8 sps:$4 sm:$0xff]  }
  0x68   :  { %1441 = vmatpush2.bf16.msra.mxu1 %v2671_v36  ;;  %1045 = vmatprep.subr.bf16.mxu0 %v2676_v16  ;;  %v2701_v36 = vld [vmem:[%s4030_s1 + $0x3a4] ss:$8 sps:$4 sm:$0xff]   ;;  %v2282_v16 = vrot.slane %v3104_v55, 9  ;;  %v2435_v55 = vrot.slane %v3185_v28, 10 }
  0x69   :  { %1442 = vmatprep.subr.bf16.mxu1 %v2680_v37  ;;  %v2696_v37 = vld [vmem:[%s4030_s1 + $0x2a0] ss:$8 sps:$4 sm:$0xff]   ;;  %v1155_v51 = vor.u32 %v3450_v35, %v3446_v49  ;;  %v2437_v35 = vrot.slane %v3261_v27, 10 }
  0x6a   :  { %v3514_v49 = vsel %vm3116_vm5, %v2435_v55, %v1532_v41  ;;  %v2708_v41 = vld [vmem:[%s4030_s1 + $0x280] ss:$8 sps:$4 sm:$0xff]  }
  0x6b   :  { %1046 = vmatpush2.bf16.msra.mxu0 %v2674_v53  ;;  %v782_v53 = vrot.slane %v3109_v57, 5  ;;  %v1161_v57 = vshrl.u32 %v3190_v29, 16 }
  0x6c   :  { %1443 = vmatpush2.bf16.msra.mxu1 %v2678_v22  ;;  %1047 = vmatprep.subr.bf16.mxu0 %v2684_v54  ;;  %v2704_v22 = vld [vmem:[%s4030_s1 + $0x294] ss:$8 sps:$4 sm:$0xff]   ;;  %v1140_v54 = vrot.slane %v1139_v17, 4  ;;  %v2705_v17 = vld [vmem:[%s4030_s1 + $0x390] ss:$8 sps:$4 sm:$0xff]  }
  0x6d   :  { %1444 = vmatprep.subr.bf16.mxu1 %v2687_v50  ;;  %v1145_v50 = vor.u32 %v3440_v63, %v3436_v44  ;;  %v2436_v63 = vrot.slane %v3195_v30, 10  ;;  %v3546_v55 = vsel %vm3337_vm11, %v2282_v16, %v782_v53  ;;  %v2711_v16 = vld [vmem:[%s4030_s1 + $0x380] ss:$8 sps:$4 sm:$0xff]  }
  0x6f   :  { %1048 = vmatpush2.bf16.msra.mxu0 %v2682_v10  ;;  %v2433_v10 = vrot.slane %v3091_v46, 10  ;;  %v3550_v46 = vsel %vm3289_vm10, %v1140_v54, %v1145_v50  ;;  %v1163_v54 = vrot.slane %v1161_v57, 5  ;;  %v2391_v57 = vcombine.low %v3317_v25, %v3321_v19 }
  0x70   :  { %1445 = vmatpush2.bf16.msra.mxu1 %v2685_v12  ;;  %1049 = vmatprep.subr.bf16.mxu0 %v2690_v14  ;;  %v1524_v12 = vrot.slane %v3096_v47, 6  ;;  %v1150_v14 = vrot.slane %v1149_v48, 4  ;;  %v1158_v47 = vrot.slane %v134_v42, 6  ;;  %v2702_v42 = vld [vmem:[%s4030_s1 + $0x290] ss:$8 sps:$4 sm:$0xff]  }
  0x71   :  { %1446 = vmatprep.subr.bf16.mxu1 %v2694_v58  ;;  %v1167_v58 = vrot.slane %v145_v40, 5  ;;  %v2710_v48 = vld [vmem:[%s4030_s1 + $0x284] ss:$8 sps:$4 sm:$0xff]  }
  0x72   :  { %v3486_v8 = vsel %vm3116_vm5, %v2433_v10, %v1524_v12  ;;  %v1171_v10 = vshrl.u32 %v3206_v39, 16  ;;  %v1159_v53 = vor.u32 %v1158_v47, %v1157_v26  ;;  %v1174_v26 = vrot.slane %v154_v52, 6  ;;  %v2714_v52 = vld [vmem:[%s4030_s1 + $0x470] ss:$8 sps:$4 sm:$0xff]  }
  0x73   :  { %1050 = vmatpush2.bf16.msra.mxu0 %v2688_v15  ;;  %v3494_v15 = vsel %vm3116_vm5, %v2434_v20, %v1528_v21  ;;  %v1544_v20 = vrot.slane %v3282_v2, 6  ;;  %v2319_v47 = vcombine.low %v3372_v62, %v3376_v9  ;;  %v790_v9 = vrot.slane %v3206_v39, 5 }
  0x74   :  { %1447 = vmatpush2.bf16.msra.mxu1 %v2692_v0  ;;  %1051 = vmatprep.subr.bf16.mxu0 %v2698_v60  ;;  %v2474_v44 = vcombine.high %v3486_v8, %v3494_v15  ;;  %v2473_v40 = vcombine.low %v3486_v8, %v3494_v15  ;;  %v1536_v0 = vrot.slane %v3206_v39, 6  ;;  %v1540_v60 = vrot.slane %v3266_v33, 6 }
  0x75   :  { %1448 = vmatprep.subr.bf16.mxu1 %v2701_v36  ;;  %v2438_v36 = vrot.slane %v3271_v38, 10  ;;  %v1160_v25 = vrot.slane %v1159_v53, 4  ;;  %v1187_v39 = vrot.slane %v173_v34, 5  ;;  %v2722_v34 = vld [vmem:[%s4030_s1 + $0x454] ss:$8 sps:$4 sm:$0xff]  }
  0x76   :  { %v3527_v12 = vsel %vm3116_vm5, %v2436_v63, %v1536_v0  ;;  %v1173_v63 = vrot.slane %v1171_v10, 5 }
  0x77   :  { %1052 = vmatpush2.bf16.msra.mxu0 %v2696_v37  ;;  %v2713_v37 = vld [vmem:[%s4030_s1 + $0x384] ss:$8 sps:$4 sm:$0xff]   ;;  %v2476_v21 = vcombine.high %v3514_v49, %v3527_v12 }
  0x78   :  { %1449 = vmatpush2.bf16.msra.mxu1 %v2699_v1  ;;  %1053 = vmatprep.subr.bf16.mxu0 %v2704_v22  ;;  %v1168_v1 = vrot.slane %v148_v45, 6  ;;  %v3534_v22 = vsel %vm3337_vm11, %v2281_v59, %v778_v7  ;;  %v2475_v45 = vcombine.low %v3514_v49, %v3527_v12  ;;  %v1164_v59 = vrot.slane %v140_v43, 6  ;;  %v2716_v43 = vld [vmem:[%s4030_s1 + $0x474] ss:$8 sps:$4 sm:$0xff]  }
  0x79   :  { %1450 = vmatprep.subr.bf16.mxu1 %v2707_v11  ;;  %v3542_v11 = vsel %vm3116_vm5, %v2437_v35, %v1540_v60  ;;  %v3556_v7 = vsel %vm3116_vm5, %v2438_v36, %v1544_v20  ;;  %v2322_v0 = vcombine.high %v3534_v22, %v3546_v55  ;;  %v786_v35 = vrot.slane %v3190_v29, 5 }
  0x7a   :  { %v2478_v50 = vcombine.high %v3542_v11, %v3556_v7  ;;  %v2477_v61 = vcombine.low %v3542_v11, %v3556_v7  ;;  %v1165_v19 = vor.u32 %v1164_v59, %v1163_v54  ;;  %v1181_v60 = vshrl.u32 %v3266_v33, 16 }
  0x7b   :  { %1054 = vmatpush2.bf16.msra.mxu0 %v2702_v42  ;;  %v1156_v42 = vsel %vm3289_vm10, %v1150_v14, %v1155_v51  ;;  %v2284_v14 = vrot.slane %v3195_v30, 9  ;;  %v1175_v51 = vor.u32 %v1174_v26, %v1173_v63  ;;  %v1177_v30 = vrot.slane %v159_v3, 5  ;;  %v2717_v3 = vld [vmem:[%s4030_s1 + $0x460] ss:$8 sps:$4 sm:$0xff]   ;;  %v2720_v63 = vld [vmem:[%s4030_s1 + $0x450] ss:$8 sps:$4 sm:$0xff]  }
  0x7c   :  { %1451 = vmatpush2.bf16.msra.mxu1 %v2705_v17  ;;  %1055 = vmatprep.subr.bf16.mxu0 %v2710_v48  ;;  %v1169_v17 = vor.u32 %v1168_v1, %v1167_v58  ;;  %v2283_v48 = vrot.slane %v3185_v28, 9  ;;  %v2394_v62 = vcombine.high %v3550_v46, %v1156_v42  ;;  %v2719_v28 = vld [vmem:[%s4030_s1 + $0x464] ss:$8 sps:$4 sm:$0xff]   ;;  %v1178_v58 = vrot.slane %v162_v4, 6 }
  0x7d   :  { %1452 = vmatprep.subr.bf16.mxu1 %v2713_v37  ;;  %v1188_v36 = vrot.slane %v176_v5, 6  ;;  %v1191_v37 = vshrl.u32 %v3282_v2, 16  ;;  %v791_v1 = vsel %vm3337_vm11, %v2284_v14, %v790_v9  ;;  %v1166_v5 = vsel %vm3289_vm10, %v1160_v25, %v1165_v19  ;;  %v2726_v9 = vld [vmem:[%s4030_s1 + $0x430] ss:$8 sps:$4 sm:$0xff]  }
  0x7e   :  { %v1170_v29 = vrot.slane %v1169_v17, 4  ;;  %v787_v4 = vsel %vm3337_vm11, %v2283_v48, %v786_v35  ;;  %v1179_v20 = vor.u32 %v1178_v58, %v1177_v30  ;;  %v1184_v59 = vrot.slane %v168_v31, 6  ;;  %v2725_v31 = vld [vmem:[%s4030_s1 + $0x444] ss:$8 sps:$4 sm:$0xff]   ;;  %v2732_v30 = vld [vmem:[%s4030_s1 + $0x410] ss:$8 sps:$4 sm:$0xff]  }
  0x7f   :  { %1056 = vmatpush2.bf16.msra.mxu0 %v2708_v41  ;;  %v1183_v41 = vrot.slane %v1181_v60, 5  ;;  %v1193_v53 = vrot.slane %v1191_v37, 5  ;;  %v1194_v54 = vrot.slane %v182_v6, 6  ;;  %v2393_v17 = vcombine.low %v3550_v46, %v1156_v42  ;;  %v2737_v58 = vld [vmem:[%s4030_s1 + $0x404] ss:$8 sps:$4 sm:$0xff]  }
  0x80   :  { %1453 = vmatpush2.bf16.msra.mxu1 %v2711_v16  ;;  %1771 = vmatprep.subr.bf16.mxu0 %v2716_v43  ;;  %v1176_v10 = vsel %vm3289_vm10, %v1170_v29, %v1175_v51  ;;  %v1189_v16 = vor.u32 %v1188_v36, %v1187_v39  ;;  %v2321_v43 = vcombine.low %v3534_v22, %v3546_v55  ;;  %v794_v6 = vrot.slane %v3266_v33, 5  ;;  %v2728_v33 = vld [vmem:[%s4030_s1 + $0x434] ss:$8 sps:$4 sm:$0xff]   ;;  %v2735_v60 = vld [vmem:[%s4030_s1 + $0x400] ss:$8 sps:$4 sm:$0xff]  }
  0x81   :  { %v2324_v26 = vcombine.high %v787_v4, %v791_v1  ;;  %v2286_v22 = vrot.slane %v3271_v38, 9  ;;  %v798_v55 = vrot.slane %v3282_v2, 5  ;;  %v1180_v46 = vrot.slane %v1179_v20, 4  ;;  %v2740_v39 = vld [vmem:[%s4030_s1 + $0x4f4] ss:$8 sps:$4 sm:$0xff]  }
  0x82   :  { %1058 = vmatmul.mubr.bf16.vlgmr.msra.gmra.mxu0 %v2319_v47  ;;  %v2285_v47 = vrot.slane %v3261_v27, 9  ;;  %v1185_v42 = vor.u32 %v1184_v59, %v1183_v41  ;;  %v1195_v48 = vor.u32 %v1194_v54, %v1193_v53  ;;  %v2723_v27 = vld [vmem:[%s4030_s1 + $0x440] ss:$8 sps:$4 sm:$0xff]   ;;  %v2738_v36 = vld [vmem:[%s4030_s1 + $0x4f0] ss:$8 sps:$4 sm:$0xff]   ;;  %v2762_v12 = vmov 0.0  }
  0x83   :  { %1455 = vmatmul.mubr.bf16.vlgmr.msra.gmra.mxu1 %v2391_v57  ;;  %1772 = vmatpush1.bf16.msra.mxu0 %v2714_v52  ;;  %v2396_v57 = vcombine.high %v1166_v5, %v1176_v10  ;;  %v799_v2 = vsel %vm3337_vm11, %v2286_v22, %v798_v55  ;;  %v2323_v52 = vcombine.low %v787_v4, %v791_v1  ;;  %v2743_v37 = vld [vmem:[%s4030_s1 + $0x4e4] ss:$8 sps:$4 sm:$0xff]   ;;  %v2744_v4 = vld [vmem:[%s4030_s1 + $0x4d0] ss:$8 sps:$4 sm:$0xff]   ;;  %v2753_v59 = vld [vmem:[%s4030_s1 + $0x4a0] ss:$8 sps:$4 sm:$0xff]  }
  0x84   :  { %1067 = vmatprep.mubr.bf16.mxu0 %v2322_v0  ;;  %1773 = vmatprep.subr.bf16.mxu0 %v2719_v28  ;;  %v1190_v0 = vrot.slane %v1189_v16, 4  ;;  %v795_v38 = vsel %vm3337_vm11, %v2285_v47, %v794_v6  ;;  %v1186_v35 = vsel %vm3289_vm10, %v1180_v46, %v1185_v42  ;;  %v2734_v28 = vld [vmem:[%s4030_s1 + $0x414] ss:$8 sps:$4 sm:$0xff]   ;;  %v2749_v1 = vld [vmem:[%s4030_s1 + $0x4c4] ss:$8 sps:$4 sm:$0xff]  }
  0x85   :  { %1464 = vmatprep.mubr.bf16.mxu1 %v2394_v62  ;;  %v2395_v62 = vcombine.low %v1166_v5, %v1176_v10  ;;  %v2326_v25 = vcombine.high %v795_v38, %v799_v2  ;;  %v2325_v29 = vcombine.low %v795_v38, %v799_v2  ;;  %v2752_v5 = vld [vmem:[%s4030_s1 + $0x4b4] ss:$8 sps:$4 sm:$0xff]   ;;  %v2750_v10 = vld [vmem:[%s4030_s1 + $0x4b0] ss:$8 sps:$4 sm:$0xff]   ;;  %v2755_v20 = vld [vmem:[%s4030_s1 + $0x4a4] ss:$8 sps:$4 sm:$0xff]   ;;  %2092 = vmatprep.subr.mxu1 %v2762_v12 }
  0x86   :  { %v1196_v14 = vsel %vm3289_vm10, %v1190_v0, %v1195_v48  ;;  %v2758_v41 = vld [vmem:[%s4030_s1 + $0x494] ss:$8 sps:$4 sm:$0xff]   ;;  %v2756_v16 = vld [vmem:[%s4030_s1 + $0x490] ss:$8 sps:$4 sm:$0xff]   ;;  %v2761_v53 = vld [vmem:[%s4030_s1 + $0x484] ss:$8 sps:$4 sm:$0xff]  }
  0x87   :  { %1774 = vmatpush1.bf16.msra.mxu0 %v2717_v3  ;;  %v2398_v19 = vcombine.high %v1186_v35, %v1196_v14  ;;  %v2397_v51 = vcombine.low %v1186_v35, %v1196_v14  ;;  %v2746_v3 = vld [vmem:[%s4030_s1 + $0x4d4] ss:$8 sps:$4 sm:$0xff]   ;;  %v2759_v54 = vld [vmem:[%s4030_s1 + $0x480] ss:$8 sps:$4 sm:$0xff]  }
  0x88   :  { %1775 = vmatprep.subr.bf16.mxu0 %v2722_v34  ;;  %v2747_v34 = vld [vmem:[%s4030_s1 + $0x4c0] ss:$8 sps:$4 sm:$0xff]   ;;  %v2034_v42 = vld [vmem:[%s4032_s4 + $0x38] sm:$0xff]  ;;  %v2033_v48 = vld [vmem:[%s4032_s4 + $0x30] sm:$0xff] }
  0x89   :  { %v2036_v6 = vld [vmem:[%s4032_s4 + $0x48] sm:$0xff]  ;;  %v2035_v55 = vld [vmem:[%s4032_s4 + $0x40] sm:$0xff]  ;;  %v2030_v14 = vld [vmem:[%s4032_s4 + $0x18] sm:$0xff] }
  0x8a   :  { %1068 = vmatmul.mubr.bf16.gmra.mxu0 %v2321_v43  ;;  %v2031_v2 = vld [vmem:[%s4032_s4 + $0x20] sm:$0xff] }
  0x8b   :  { %1465 = vmatmul.mubr.bf16.gmra.mxu1 %v2393_v17  ;;  %1776 = vmatpush1.bf16.msra.mxu0 %v2720_v63  ;;  %v2039_v17 = vld [vmem:[%s4032_s4 + $0x60] sm:$0xff] }
  0x8c   :  { %1077 = vmatprep.mubr.bf16.mxu0 %v2324_v26  ;;  %1777 = vmatprep.subr.bf16.mxu0 %v2725_v31  ;;  %v2038_v26 = vld [vmem:[%s4032_s4 + $0x58] sm:$0xff]  ;;  %v2037_v31 = vld [vmem:[%s4032_s4 + $0x50] sm:$0xff] }
  0x8d   :  { %1474 = vmatprep.mubr.bf16.mxu1 %v2396_v57 }
  0x8f   :  { %1778 = vmatpush1.bf16.msra.mxu0 %v2723_v27 }
  0x90   :  { %1779 = vmatprep.subr.bf16.mxu0 %v2728_v33  ;;  %v2032_v33 = vld [vmem:[%s4032_s4 + $0x28] sm:$0xff] }
  0x92   :  { %1078 = vmatmul.mubr.bf16.gmra.mxu0 %v2323_v52  ;;  %v2029_v52 = vld [vmem:[%s4032_s4 + $0x10] sm:$0xff] }
  0x93   :  { %1475 = vmatmul.mubr.bf16.gmra.mxu1 %v2395_v62  ;;  %1780 = vmatpush1.bf16.msra.mxu0 %v2726_v9  ;;  %v2028_v9 = vld [vmem:[%s4032_s4 + $0x8] sm:$0xff] }
  0x94   :  { %1087 = vmatprep.mubr.bf16.mxu0 %v2326_v25  ;;  %1781 = vmatprep.subr.bf16.mxu0 %v2731_v24  ;;  %v2027_v24 = vld [vmem:[%s4032_s4] sm:$0xff] }
  0x95   :  { %1484 = vmatprep.mubr.bf16.mxu1 %v2398_v19 }
  0x97   :  { %1782 = vmatpush1.bf16.msra.mxu0 %v2729_v32  ;;  %v2044_v32 = vld [vmem:[%s4032_s4 + $0x88] sm:$0xff] }
  0x98   :  { %1783 = vmatprep.subr.bf16.mxu0 %v2734_v28 }
  0x9a   :  { %1088 = vmatmul.mubr.bf16.gmra.mxu0 %v2325_v29  ;;  %v2043_v29 = vld [vmem:[%s4032_s4 + $0x80] sm:$0xff] }
  0x9b   :  { %1485 = vmatmul.mubr.bf16.gmra.mxu1 %v2397_v51  ;;  %1784 = vmatpush1.bf16.msra.mxu0 %v2732_v30 }
  0x9c   :  { %1803 = vmatprep.mubr.bf16.mxu0 %v2472_v23  ;;  %1785 = vmatprep.subr.bf16.mxu0 %v2737_v58  ;;  %v2741_v23 = vld [vmem:[%s4030_s1 + $0x4e0] ss:$8 sps:$4 sm:$0xff]  }
  0x9f   :  { %1786 = vmatpush1.bf16.msra.mxu0 %v2735_v60 }
  0xa0   :  { %1787 = vmatprep.subr.bf16.mxu0 %v2740_v39 }
  0xa3   :  { %1788 = vmatpush2.bf16.msra.mxu0 %v2738_v36 }
  0xa4   :  { %1789 = vmatprep.subr.bf16.mxu0 %v2743_v37 }
  0xa7   :  { %1790 = vmatpush2.bf16.msra.mxu0 %v2741_v23 }
  0xa8   :  { %1791 = vmatprep.subr.bf16.mxu0 %v2746_v3 }
  0xab   :  { %1792 = vmatpush2.bf16.msra.mxu0 %v2744_v4 }
  0xac   :  { %1793 = vmatprep.subr.bf16.mxu0 %v2749_v1 }
  0xaf   :  { %1794 = vmatpush2.bf16.msra.mxu0 %v2747_v34 }
  0xb0   :  { %1795 = vmatprep.subr.bf16.mxu0 %v2752_v5 }
  0xb3   :  { %1796 = vmatpush2.bf16.msra.mxu0 %v2750_v10 }
  0xb4   :  { %1797 = vmatprep.subr.bf16.mxu0 %v2755_v20 }
  0xb7   :  { %1798 = vmatpush2.bf16.msra.mxu0 %v2753_v59 }
  0xb8   :  { %1799 = vmatprep.subr.bf16.mxu0 %v2758_v41 }
  0xbb   :  { %1800 = vmatpush2.bf16.msra.mxu0 %v2756_v16 }
  0xbc   :  { %1801 = vmatprep.subr.bf16.mxu0 %v2761_v53 }
  0xbf   :  { %1802 = vmatpush2.bf16.msra.mxu0 %v2759_v54 }
  0xc2   :  { %1804 = vmatmul.mubr.bf16.vlgmr.msra.gmra.mxu0 %v2471_v56 }
  0xc3   :  { %1813 = vmatprep.mubr.bf16.mxu0 %v2474_v44 }
  0xca   :  { %1814 = vmatmul.mubr.bf16.gmra.mxu0 %v2473_v40 }
  0xcb   :  { %1823 = vmatprep.mubr.bf16.mxu0 %v2476_v21  ;;  %v2042_v21 = vld [vmem:[%s4032_s4 + $0x78] sm:$0xff] }
  0xcc   :  { %2093 = vmatpush1.msra.mxu1 %v2042_v21 }
  0xcd   :  { %2094 = vmatprep.subr.mxu1 %v2762_v12 }
  0xd2   :  { %1824 = vmatmul.mubr.bf16.gmra.mxu0 %v2475_v45  ;;  %v2041_v45 = vld [vmem:[%s4032_s4 + $0x70] sm:$0xff] }
  0xd3   :  { %1833 = vmatprep.mubr.bf16.mxu0 %v2478_v50  ;;  %2095 = vmatpush1.msra.mxu1 %v2041_v45  ;;  %v2040_v50 = vld [vmem:[%s4032_s4 + $0x68] sm:$0xff] }
  0xd4   :  { %2096 = vmatprep.subr.mxu1 %v2762_v12 }
  0xd5   :  { %2097 = vmatpush1.msra.mxu1 %v2040_v50 }
  0xd6   :  { %2098 = vmatprep.subr.mxu1 %v2762_v12 }
  0xd7   :  { %2099 = vmatpush1.msra.mxu1 %v2039_v17 }
  0xd8   :  { %2100 = vmatprep.subr.mxu1 %v2762_v12 }
  0xd9   :  { %2101 = vmatpush1.msra.mxu1 %v2038_v26 }
  0xda   :  { %1834 = vmatmul.mubr.bf16.gmra.mxu0 %v2477_v61  ;;  %2102 = vmatprep.subr.mxu1 %v2762_v12 }
  0xdb   :  { %2103 = vmatpush1.msra.mxu1 %v2037_v31 }
  0xdc   :  { %2104 = vmatprep.subr.mxu1 %v2762_v12 }
  0xdd   :  { %2105 = vmatpush1.msra.mxu1 %v2036_v6 }
  0xde   :  { %2106 = vmatprep.subr.mxu1 %v2762_v12 }
  0xdf   :  { %2107 = vmatpush1.msra.mxu1 %v2035_v55  ;;  %v1862_v55 = vlaneseq }
  0xe0   :  { %2108 = vmatprep.subr.mxu1 %v2762_v12 }
  0xe1   :  { %2109 = vmatpush1.msra.mxu1 %v2034_v42 }
  0xe2   :  { %2110 = vmatprep.subr.mxu1 %v2762_v12 }
  0xe3   :  { %2111 = vmatpush1.msra.mxu1 %v2033_v48 }
  0xe4   :  { %2112 = vmatprep.subr.mxu1 %v2762_v12 }
  0xe5   :  { %2113 = vmatpush1.msra.mxu1 %v2032_v33  ;;  %v1863_v33 = vshrl.u32 %v1862_v55, 7 }
  0xe6   :  { %2114 = vmatprep.subr.mxu1 %v2762_v12 }
  0xe7   :  { %2115 = vmatpush1.msra.mxu1 %v2031_v2 }
  0xe8   :  { %2116 = vmatprep.subr.mxu1 %v2762_v12 }
  0xe9   :  { %2117 = vmatpush1.msra.mxu1 %v2030_v14 }
  0xea   :  { %2118 = vmatprep.subr.mxu1 %v2762_v12 }
  0xeb   :  { %2119 = vmatpush1.msra.mxu1 %v2029_v52  ;;  %v1864_v52 = vsub.s32 0, %v1863_v33 }
  0xec   :  { %2120 = vmatprep.subr.mxu1 %v2762_v12 }
  0xed   :  { %2121 = vmatpush1.msra.mxu1 %v2028_v9  ;;  %v1868_v9 = vsub.s32 1, %v1863_v33 }
  0xee   :  { %2122 = vmatprep.subr.mxu1 %v2762_v12 }
  0xef   :  { %2123 = vmatpush1.msra.mxu1 %v2027_v24 }
  0xf0   :  { %2152 = vmatprep.subr.mxu1 %v2762_v12 }
  0xf1   :  { %2153 = vmatpush2.msra.mxu1 %v2044_v32  ;;  %v1860_v32 = vld [vmem:[%s4033_s2] sm:$0x3] }
  0xf2   :  { %2154 = vmatprep.subr.mxu1 %v2762_v12 }
  0xf3   :  { %2155 = vmatpush2.msra.mxu1 %v2043_v29 }
 0x102   :  { %v3740_v13 = vpop.f32.mrf.mxu0 }
 0x103   :  { %v3748_v15 = vpop.f32.mrf.mxu1 }
 0x104   :  { %v3742_v18 = vpop.f32.mrf.mxu0  ;;  %v719_v24 = vadd.f32 %v3748_v15, %v3740_v13  ;;  %v3899_v13 = vrot.slane %v1860_v32, %v1868_v9 }
 0x105   :  { %v3752_v40 = vpop.f32.mrf.mxu1 }
 0x106   :  { %v3744_v56 = vpop.f32.mrf.mxu0 }
 0x107   :  { %v3764_v11 = vpop.f32.mrf.mxu1 }
 0x108   :  { %v3746_v8 = vpop.f32.mrf.mxu0 }
 0x109   :  { %v3772_v61 = vpop.f32.mrf.mxu1 }
 0x10a   :  { %v725_v33 = vadd.f32 %v3772_v61, %v3746_v8 }
 0x10b   :  { %v3780_v63 = vpop.f32.mrf.mxu1 }
 0x10d   :  { %v3750_v44 = vpop.f32.mrf.mxu0  ;;  %v3792_v57 = vpop.f32.mrf.mxu1 }
 0x10e   :  { %v729_v15 = vadd.f32 %v3780_v63, %v3750_v44 }
 0x10f   :  { %v3754_v49 = vpop.f32.mrf.mxu0  ;;  %v3804_v46 = vpop.f32.mrf.mxu1 }
 0x111   :  { %v3766_v7 = vpop.f32.mrf.mxu0  ;;  %v3816_v27 = vpop.f32.mrf.mxu1 }
 0x113   :  { %v3775_v43 = vpop.f32.mrf.mxu0  ;;  %v3828_v35 = vpop.f32.mrf.mxu1 }
 0x115   :  { %v3843_v25 = vpop.f32.mrf.mxu1 }
 0x117   :  { %v3855_v28 = vpop.f32.mrf.mxu1 }
 0x119   :  { %v3786_v47 = vpop.f32.mrf.mxu0  ;;  %v744_v30 = vpop.f32.mrf.mxu1 }
 0x11a   :  { %v739_v8 = vadd.f32 %v3828_v35, %v3786_v47 }
 0x11b   :  { %v3798_v22 = vpop.f32.mrf.mxu0  ;;  %v748_v60 = vpop.f32.mrf.mxu1 }
 0x11d   :  { %v3810_v0 = vpop.f32.mrf.mxu0  ;;  %v750_v36 = vpop.f32.mrf.mxu1 }
 0x11e   :  { %v743_v44 = vadd.f32 %v3855_v28, %v3810_v0 }
 0x11f   :  { %v3822_v38 = vpop.f32.mrf.mxu0  ;;  %v752_v23 = vpop.f32.mrf.mxu1 }
 0x121   :  { %v3837_v62 = vpop.f32.mrf.mxu0  ;;  %v3866_v4 = vpop.f32.mrf.mxu1 }
 0x123   :  { %v3849_v19 = vpop.f32.mrf.mxu0 }
 0x125   :  { %v3861_v51 = vpop.f32.mrf.mxu0 }
 0x127   :  { %v3864_v58 = vpop.f32.mrf.mxu0 }
 0x128   :  { %v755_v0 = vadd.f32 %v3866_v4, %v3864_v58 }
 0x142   :  { %v1059_v39 = vpop.f32.mrf.mxu0 }
 0x143   :  { %v1456_v34 = vpop.f32.mrf.mxu1 }
 0x144   :  { %v1061_v37 = vpop.f32.mrf.mxu0 }
 0x145   :  { %v1458_v10 = vpop.f32.mrf.mxu1 }
 0x146   :  { %v1063_v3 = vpop.f32.mrf.mxu0 }
 0x147   :  { %v1460_v59 = vpop.f32.mrf.mxu1 }
 0x148   :  { %v1065_v1 = vpop.f32.mrf.mxu0 }
 0x149   :  { %v1462_v16 = vpop.f32.mrf.mxu1 }
 0x14a   :  { %v1069_v5 = vpop.f32.mrf.mxu0 }
 0x14b   :  { %v1466_v54 = vpop.f32.mrf.mxu1 }
 0x14c   :  { %v1071_v20 = vpop.f32.mrf.mxu0 }
 0x14d   :  { %v1468_v21 = vpop.f32.mrf.mxu1 }
 0x14e   :  { %v1073_v41 = vpop.f32.mrf.mxu0 }
 0x14f   :  { %v3868_v50 = vpop.f32.mrf.mxu1 }
 0x150   :  { %v1075_v53 = vpop.f32.mrf.mxu0 }
 0x151   :  { %v3870_v26 = vpop.f32.mrf.mxu1 }
 0x152   :  { %v1079_v12 = vpop.f32.mrf.mxu0 }
 0x153   :  { %v3872_v6 = vpop.f32.mrf.mxu1 }
 0x154   :  { %v1081_v45 = vpop.f32.mrf.mxu0 }
 0x155   :  { %v3876_v48 = vpop.f32.mrf.mxu1 }
 0x156   :  { %v1083_v17 = vpop.f32.mrf.mxu0  ;;  %4046 = vst [vmem:[#allocation3_spill] sm:$0xff] %v3876_v48  ;;  %v1098_v48 = vadd.f32 %v1059_v39, %v719_v24 }
 0x157   :  { %v3880_v14 = vpop.f32.mrf.mxu1 }
 0x158   :  { %v1085_v31 = vpop.f32.mrf.mxu0  ;;  %4048 = vst [vmem:[#allocation5_spill] sm:$0xff] %v3880_v14  ;;  %v723_v14 = vadd.f32 %v3764_v11, %v3744_v56  ;;  %v735_v56 = vadd.f32 %v3816_v27, %v3775_v43  ;;  %v741_v11 = vadd.f32 %v3843_v25, %v3798_v22  ;;  %v1495_v63 = vadd.f32 %v1456_v34, %v1098_v48 }
 0x159   :  { %v3891_v55 = vpop.f32.mrf.mxu1  ;;  %v751_v43 = vadd.f32 %v750_v36, %v3849_v19  ;;  %v753_v22 = vadd.f32 %v752_v23, %v3861_v51  ;;  %v3925_v23 = vld [vmem:[%s4034_s3] sm:$0xff] }
 0x15a   :  { %v3874_v42 = vpop.f32.mrf.mxu0  ;;  %v1100_v61 = vadd.f32 %v1063_v3, %v723_v14  ;;  %v1105_v3 = vadd.f32 %v1075_v53, %v735_v56 }
 0x15b   :  { %4045 = vst [vmem:[#allocation2_spill] sm:$0xff] %v3874_v42  ;;  %v721_v42 = vadd.f32 %v3752_v40, %v3742_v18  ;;  %v733_v18 = vadd.f32 %v3804_v46, %v3766_v7  ;;  %v745_v7 = vadd.f32 %v744_v30, %v3822_v38  ;;  %v749_v46 = vadd.f32 %v748_v60, %v3837_v62 }
 0x15c   :  { %v3878_v2 = vpop.f32.mrf.mxu0  ;;  %v1497_v28 = vadd.f32 %v1460_v59, %v1100_v61 }
 0x15d   :  { %4047 = vst [vmem:[#allocation4_spill] sm:$0xff] %v3878_v2  ;;  %v3897_v2 = vrot.slane %v1860_v32, %v1864_v52  ;;  %v1099_v40 = vadd.f32 %v1061_v37, %v721_v42  ;;  %v1486_v52 = vpop.f32.mrf.mxu1  ;;  %v1104_v25 = vadd.f32 %v1073_v41, %v733_v18  ;;  %v1109_v51 = vadd.f32 %v1085_v31, %v745_v7  ;;  %v4052_v9 = vld [vmem:[#allocation3_spill] sm:$0xff] }
 0x15e   :  { %v3887_v29 = vpop.f32.mrf.mxu0 }
 0x15f   :  { %4049 = vst [vmem:[#allocation6_spill] sm:$0xff] %v3887_v29  ;;  %v731_v29 = vadd.f32 %v3792_v57, %v3754_v49  ;;  %v1101_v49 = vadd.f32 %v1065_v1, %v725_v33  ;;  %v1102_v57 = vadd.f32 %v1069_v5, %v729_v15  ;;  %v1496_v35 = vadd.f32 %v1458_v10, %v1099_v40  ;;  %v1488_v62 = vpop.f32.mrf.mxu1  ;;  %v4053_v24 = vld [vmem:[#allocation5_spill] sm:$0xff] }
 0x160   :  { %v1095_v39 = vpop.f32.mrf.mxu0  ;;  %v1106_v1 = vadd.f32 %v1079_v12, %v739_v8  ;;  %v1107_v5 = vadd.f32 %v1081_v45, %v741_v11  ;;  %v1501_v4 = vadd.f32 %v3868_v50, %v1104_v25 }
 0x161   :  { %v1103_v27 = vadd.f32 %v1071_v20, %v731_v29  ;;  %v1498_v38 = vadd.f32 %v1462_v16, %v1101_v49  ;;  %v1499_v30 = vadd.f32 %v1466_v54, %v1102_v57  ;;  %v1108_v20 = vadd.f32 %v1083_v17, %v743_v44  ;;  %v3938_v17 = vld [vmem:[%s4034_s3 + $0x8] sm:$0xff]  ;;  %v1490_v50 = vpop.f32.mrf.mxu1 }
 0x162   :  { %v1502_v16 = vadd.f32 %v3870_v26, %v1105_v3  ;;  %v3931_v53 = vadd.f32 %v3872_v6, %v1106_v1  ;;  %v4050_v54 = vld [vmem:[#allocation2_spill] sm:$0xff]  ;;  %v3943_v6 = vadd.f32 %v4052_v9, %v1107_v5  ;;  %v3949_v29 = vadd.f32 %v3891_v55, %v1109_v51 }
 0x163   :  { %v1500_v36 = vadd.f32 %v1468_v21, %v1103_v27  ;;  %v1110_v12 = vadd.f32 %v4050_v54, %v749_v46  ;;  %v3946_v32 = vadd.f32 %v4053_v24, %v1108_v20  ;;  %v1492_v7 = vpop.f32.mrf.mxu1 }
 0x164   :  { %v4051_v21 = vld [vmem:[#allocation4_spill] sm:$0xff] }
 0x165   :  { %v1111_v45 = vadd.f32 %v4051_v21, %v751_v43  ;;  %v3954_v61 = vadd.f32 %v1486_v52, %v1110_v12 }
 0x166   :  { %v4054_v33 = vld [vmem:[#allocation6_spill] sm:$0xff] }
 0x167   :  { %v1112_v15 = vadd.f32 %v4054_v33, %v753_v22  ;;  %v3956_v44 = vadd.f32 %v1488_v62, %v1111_v45 }
 0x182   :  { %v1805_v47 = vpop.f32.mrf.mxu0 }
 0x183   :  { %v1844_v37 = vadd.f32 %v1805_v47, %v1495_v63  ;;  %v1113_v63 = vadd.f32 %v1095_v39, %v755_v0  ;;  %v3960_v47 = vadd.f32 %v1490_v50, %v1112_v15 }
 0x184   :  { %v1807_v34 = vpop.f32.mrf.mxu0 }
 0x185   :  { %v1872_v19 = vadd.f32 %v3897_v2, %v1844_v37  ;;  %v1845_v60 = vadd.f32 %v1807_v34, %v1496_v35  ;;  %v3964_v3 = vadd.f32 %v1492_v7, %v1113_v63 }
 0x186   :  { %v1809_v58 = vpop.f32.mrf.mxu0 }
 0x187   :  { %v1888_v10 = vmax.f32 %v1872_v19, 0.0  ;;  %v1873_v59 = vadd.f32 %v3899_v13, %v1845_v60  ;;  %v1846_v41 = vadd.f32 %v1809_v58, %v1497_v28 }
 0x188   :  { %v1811_v31 = vpop.f32.mrf.mxu0 }
 0x189   :  { %v1906_v42 = vadd.f32 %v3925_v23, %v1888_v10  ;;  %v1889_v48 = vmax.f32 %v1873_v59, 0.0  ;;  %v1874_v14 = vadd.f32 %v3897_v2, %v1846_v41  ;;  %v1847_v26 = vadd.f32 %v1811_v31, %v1498_v38 }
 0x18a   :  { %v1815_v18 = vpop.f32.mrf.mxu0 }
 0x18b   :  { %v1922_v40 = vrot.slane %v1906_v42, 4  ;;  %v1907_v56 = vadd.f32 %v3938_v17, %v1889_v48  ;;  %v1890_v8 = vmax.f32 %v1874_v14, 0.0  ;;  %v1875_v11 = vadd.f32 %v3899_v13, %v1847_v26 }
 0x18c   :  { %v1848_v49 = vadd.f32 %v1815_v18, %v1499_v30  ;;  %v1817_v57 = vpop.f32.mrf.mxu0 }
 0x18d   :  { %v1923_v46 = vmax.f32 %v1906_v42, %v1922_v40  ;;  %v1929_v55 = vsel %vm1928_vm12, %v1907_v56, -inf  ;;  %v1908_v43 = vadd.f32 %v3925_v23, %v1890_v8  ;;  %v1891_v27 = vmax.f32 %v1875_v11, 0.0 }
 0x18e   :  { %v1930_v22 = vrot.slane %v1929_v55, 4  ;;  %v1876_v35 = vadd.f32 %v3897_v2, %v1848_v49  ;;  %v1849_v25 = vadd.f32 %v1817_v57, %v1500_v36  ;;  %v1819_v52 = vpop.f32.mrf.mxu0 }
 0x18f   :  { %v1924_v37 = vrot.slane %v1923_v46, 2  ;;  %v1936_v28 = vrot.slane %v1908_v43, 4  ;;  %v1909_v39 = vadd.f32 %v3938_v17, %v1891_v27  ;;  %v1850_v0 = vadd.f32 %v1819_v52, %v1501_v4 }
 0x190   :  { %v1931_v1 = vmax.f32 %v1929_v55, %v1930_v22  ;;  %v1892_v34 = vmax.f32 %v1876_v35, 0.0  ;;  %v1877_v38 = vadd.f32 %v3899_v13, %v1849_v25  ;;  %v1821_v30 = vpop.f32.mrf.mxu0 }
 0x191   :  { %v1925_v62 = vmax.f32 %v1923_v46, %v1924_v37  ;;  %v1937_v19 = vmax.f32 %v1908_v43, %v1936_v28  ;;  %v1942_v60 = vsel %vm1928_vm12, %v1909_v39, -inf  ;;  %v1878_v36 = vadd.f32 %v3897_v2, %v1850_v0 }
 0x192   :  { %v1932_v5 = vrot.slane %v1931_v1, 2  ;;  %v1943_v20 = vrot.slane %v1942_v60, 4  ;;  %v1910_v51 = vadd.f32 %v3925_v23, %v1892_v34  ;;  %v1893_v58 = vmax.f32 %v1877_v38, 0.0  ;;  %v1825_v4 = vpop.f32.mrf.mxu0 }
 0x193   :  { %v1926_v10 = vrot.slane %v1925_v62, 1  ;;  %v1938_v59 = vrot.slane %v1937_v19, 2  ;;  %v1894_v41 = vmax.f32 %v1878_v36, 0.0  ;;  %v1851_v54 = vadd.f32 %v1821_v30, %v1502_v16 }
 0x194   :  { %v1933_v12 = vmax.f32 %v1931_v1, %v1932_v5  ;;  %v1944_v21 = vmax.f32 %v1942_v60, %v1943_v20  ;;  %v1949_v45 = vrot.slane %v1910_v51, 4  ;;  %v1911_v31 = vadd.f32 %v3938_v17, %v1893_v58  ;;  %v1827_v50 = vpop.f32.mrf.mxu0 }
 0x195   :  { %v1927_v42 = vmax.f32 %v1925_v62, %v1926_v10  ;;  %v1939_v48 = vmax.f32 %v1937_v19, %v1938_v59  ;;  %v1912_v14 = vadd.f32 %v3925_v23, %v1894_v41  ;;  %v1879_v26 = vadd.f32 %v3899_v13, %v1851_v54 }
 0x196   :  { %v1934_v9 = vrot.slane %v1933_v12, 1  ;;  %v1945_v24 = vrot.slane %v1944_v21, 2  ;;  %v1950_v33 = vmax.f32 %v1910_v51, %v1949_v45  ;;  %v1955_v15 = vsel %vm1928_vm12, %v1911_v31, -inf  ;;  %v1829_v18 = vpop.f32.mrf.mxu0 }
 0x197   :  { %v1940_v16 = vrot.slane %v1939_v48, 1  ;;  %v1956_v40 = vrot.slane %v1955_v15, 4  ;;  %v1962_v56 = vrot.slane %v1912_v14, 4  ;;  %v1895_v8 = vmax.f32 %v1879_v26, 0.0 }
 0x198   :  { %v1935_v11 = vmax.f32 %v1933_v12, %v1934_v9  ;;  %v1946_v63 = vmax.f32 %v1944_v21, %v1945_v24  ;;  %v1951_v49 = vrot.slane %v1950_v33, 2  ;;  %v1852_v57 = vadd.f32 %v1825_v4, %v3931_v53  ;;  %v1831_v7 = vpop.f32.mrf.mxu0 }
 0x199   :  { %v1941_v46 = vmax.f32 %v1939_v48, %v1940_v16  ;;  %v1957_v55 = vmax.f32 %v1955_v15, %v1956_v40  ;;  %v1963_v43 = vmax.f32 %v1912_v14, %v1962_v56  ;;  %v1913_v27 = vadd.f32 %v3938_v17, %v1895_v8 }
 0x19a   :  { %v1947_v22 = vrot.slane %v1946_v63, 1  ;;  %v1952_v35 = vmax.f32 %v1950_v33, %v1951_v49  ;;  %v1880_v25 = vadd.f32 %v3897_v2, %v1852_v57  ;;  %v1853_v52 = vadd.f32 %v1827_v50, %v3943_v6  ;;  %v1835_v37 = vpop.f32.mrf.mxu0 }
 0x19b   :  { %v2069_v28 = vsel %vm2068_vm13, %v1941_v46, %v1927_v42  ;;  %v1958_v39 = vrot.slane %v1957_v55, 2  ;;  %v1964_v0 = vrot.slane %v1963_v43, 2  ;;  %v1968_v1 = vsel %vm1928_vm12, %v1913_v27, -inf }
 0x19c   :  { %v1948_v53 = vmax.f32 %v1946_v63, %v1947_v22  ;;  %v1953_v34 = vrot.slane %v1952_v35, 1  ;;  %v1969_v38 = vrot.slane %v1968_v1, 4  ;;  %v1896_v30 = vmax.f32 %v1880_v25, 0.0  ;;  %v1837_v62 = vpop.f32.mrf.mxu0 }
 0x19d   :  { %v1959_v19 = vmax.f32 %v1957_v55, %v1958_v39  ;;  %v1965_v60 = vmax.f32 %v1963_v43, %v1964_v0  ;;  %v1881_v36 = vadd.f32 %v3899_v13, %v1853_v52  ;;  %v1854_v5 = vadd.f32 %v1829_v18, %v3946_v32 }
 0x19e   :  { %v3983_v6 = vsel %vm2068_vm13, %v1948_v53, %v1935_v11  ;;  %v1954_v20 = vmax.f32 %v1952_v35, %v1953_v34  ;;  %v1970_v51 = vmax.f32 %v1968_v1, %v1969_v38  ;;  %v1914_v58 = vadd.f32 %v3925_v23, %v1896_v30  ;;  %v1839_v32 = vpop.f32.mrf.mxu0 }
 0x19f   :  { %v1960_v4 = vrot.slane %v1959_v19, 1  ;;  %v1966_v10 = vrot.slane %v1965_v60, 1  ;;  %v1897_v59 = vmax.f32 %v1881_v36, 0.0  ;;  %v1882_v41 = vadd.f32 %v3897_v2, %v1854_v5 }
 0x1a0   :  { %v3988_v54 = vsel %vm2070_vm14, %v1954_v20, %v2069_v28  ;;  %v1971_v12 = vrot.slane %v1970_v51, 2  ;;  %v1975_v21 = vrot.slane %v1914_v58, 4  ;;  %v1855_v45 = vadd.f32 %v1831_v7, %v3949_v29 }
 0x1a1   :  { %v1961_v31 = vmax.f32 %v1959_v19, %v1960_v4  ;;  %v3991_v50 = vmax.f32 %v1965_v60, %v1966_v10  ;;  %v1915_v42 = vadd.f32 %v3938_v17, %v1897_v59  ;;  %v1898_v48 = vmax.f32 %v1882_v41, 0.0 }
 0x1a2   :  { %v1972_v14 = vmax.f32 %v1970_v51, %v1971_v12  ;;  %v1976_v26 = vmax.f32 %v1914_v58, %v1975_v21  ;;  %v1883_v9 = vadd.f32 %v3899_v13, %v1855_v45  ;;  %v1856_v24 = vadd.f32 %v1835_v37, %v3954_v61  ;;  %v1841_v61 = vpop.f32.mrf.mxu0 }
 0x1a3   :  { %v1981_v33 = vsel %vm1928_vm12, %v1915_v42, -inf  ;;  %v1916_v15 = vadd.f32 %v3925_v23, %v1898_v48  ;;  %v1857_v18 = vadd.f32 %v1837_v62, %v3956_v44  ;;  %v1858_v29 = vadd.f32 %v1839_v32, %v3960_v47 }
 0x1a4   :  { %v1973_v16 = vrot.slane %v1972_v14, 1  ;;  %v1977_v40 = vrot.slane %v1976_v26, 2  ;;  %v1982_v56 = vrot.slane %v1981_v33, 4  ;;  %v1899_v8 = vmax.f32 %v1883_v9, 0.0 }
 0x1a5   :  { %v1988_v11 = vrot.slane %v1916_v15, 4  ;;  %v1884_v63 = vadd.f32 %v3897_v2, %v1856_v24  ;;  %v1885_v49 = vadd.f32 %v3899_v13, %v1857_v18  ;;  %v1886_v57 = vadd.f32 %v3897_v2, %v1858_v29 }
 0x1a6   :  { %v1974_v7 = vmax.f32 %v1972_v14, %v1973_v16  ;;  %v1978_v46 = vmax.f32 %v1976_v26, %v1977_v40  ;;  %v1983_v55 = vmax.f32 %v1981_v33, %v1982_v56  ;;  %v1917_v43 = vadd.f32 %v3938_v17, %v1899_v8 }
 0x1a7   :  { %v1989_v44 = vmax.f32 %v1916_v15, %v1988_v11  ;;  %v1900_v47 = vmax.f32 %v1884_v63, 0.0  ;;  %v1901_v27 = vmax.f32 %v1885_v49, 0.0  ;;  %v1902_v22 = vmax.f32 %v1886_v57, 0.0 }
 0x1a8   :  { %v1979_v35 = vrot.slane %v1978_v46, 1  ;;  %v1984_v25 = vrot.slane %v1983_v55, 2  ;;  %v1994_v52 = vsel %vm1928_vm12, %v1917_v43, -inf  ;;  %v1859_v37 = vadd.f32 %v1841_v61, %v3964_v3 }
 0x1a9   :  { %v1990_v2 = vrot.slane %v1989_v44, 2  ;;  %v1995_v28 = vrot.slane %v1994_v52, 4  ;;  %v1918_v39 = vadd.f32 %v3925_v23, %v1900_v47  ;;  %v1919_v0 = vadd.f32 %v3938_v17, %v1901_v27  ;;  %v2511_v47 = vld [vmem:[%s4035_s5] ss:$0 sm:$0xff] }
 0x1aa   :  { %v1980_v1 = vmax.f32 %v1978_v46, %v1979_v35  ;;  %v1985_v53 = vmax.f32 %v1983_v55, %v1984_v25  ;;  %v1920_v34 = vadd.f32 %v3925_v23, %v1902_v22  ;;  %v1887_v38 = vadd.f32 %v3899_v13, %v1859_v37 }
 0x1ab   :  { %v1991_v30 = vmax.f32 %v1989_v44, %v1990_v2  ;;  %v1996_v62 = vmax.f32 %v1994_v52, %v1995_v28  ;;  %v2001_v19 = vrot.slane %v1918_v39, 4  ;;  %v2007_v60 = vsel %vm1928_vm12, %v1919_v0, -inf }
 0x1ac   :  { %v1986_v36 = vrot.slane %v1985_v53, 1  ;;  %v2008_v3 = vrot.slane %v2007_v60, 4  ;;  %v2014_v5 = vrot.slane %v1920_v34, 4  ;;  %v1903_v20 = vmax.f32 %v1887_v38, 0.0 }
 0x1ad   :  { %v1992_v51 = vrot.slane %v1991_v30, 1  ;;  %v1997_v58 = vrot.slane %v1996_v62, 2  ;;  %v2002_v4 = vmax.f32 %v1918_v39, %v2001_v19  ;;  %v2083_v10 = vsel %vm2070_vm14, %v1961_v31, %v3983_v6 }
 0x1ae   :  { %v1987_v59 = vmax.f32 %v1985_v53, %v1986_v36  ;;  %v2009_v41 = vmax.f32 %v2007_v60, %v2008_v3  ;;  %v2015_v23 = vmax.f32 %v1920_v34, %v2014_v5  ;;  %v1921_v13 = vadd.f32 %v3938_v17, %v1903_v20 }
 0x1af   :  { %v1993_v12 = vmax.f32 %v1991_v30, %v1992_v51  ;;  %v1998_v21 = vmax.f32 %v1996_v62, %v1997_v58  ;;  %v2003_v45 = vrot.slane %v2002_v4, 2  ;;  %v2084_v32 = vsel %vm2072_vm15, %v1974_v7, %v2083_v10 }
 0x1b0   :  { %v2010_v42 = vrot.slane %v2009_v41, 2  ;;  %v2016_v48 = vrot.slane %v2015_v23, 2  ;;  %v2020_v14 = vsel %vm1928_vm12, %v1921_v13, -inf  ;;  %v2085_v26 = vsel %vm2074_vm0, %v1987_v59, %v2084_v32 }
 0x1b1   :  { %v1999_v9 = vrot.slane %v1998_v21, 1  ;;  %v2004_v24 = vmax.f32 %v2002_v4, %v2003_v45  ;;  %v2021_v33 = vrot.slane %v2020_v14, 4  ;;  %v2073_v6 = vsel %vm2072_vm15, %v3991_v50, %v3988_v54 }
 0x1b2   :  { %v2011_v31 = vmax.f32 %v2009_v41, %v2010_v42  ;;  %v2017_v17 = vmax.f32 %v2015_v23, %v2016_v48  ;;  %v2075_v15 = vsel %vm2074_vm0, %v1980_v1, %v2073_v6 }
 0x1b3   :  { %v2000_v18 = vmax.f32 %v1998_v21, %v1999_v9  ;;  %v2005_v29 = vrot.slane %v2004_v24, 1  ;;  %v2022_v16 = vmax.f32 %v2020_v14, %v2021_v33  ;;  %v2077_v40 = vsel %vm2076_vm1, %v1993_v12, %v2075_v15 }
 0x1b4   :  { %v2012_v56 = vrot.slane %v2011_v31, 1  ;;  %v2018_v49 = vrot.slane %v2017_v17, 1 }
 0x1b5   :  { %v2006_v8 = vmax.f32 %v2004_v24, %v2005_v29  ;;  %v2023_v11 = vrot.slane %v2022_v16, 2  ;;  %v2086_v63 = vsel %vm2076_vm1, %v2000_v18, %v2085_v26 }
 0x1b6   :  { %v2013_v7 = vmax.f32 %v2011_v31, %v2012_v56  ;;  %v2019_v50 = vmax.f32 %v2017_v17, %v2018_v49 }
 0x1b7   :  { %v2024_v57 = vmax.f32 %v2022_v16, %v2023_v11  ;;  %v2079_v61 = vsel %vm2078_vm2, %v2006_v8, %v2077_v40 }
 0x1b8   :  { %v2087_v55 = vsel %vm2078_vm2, %v2013_v7, %v2086_v63  ;;  %v2081_v44 = vsel %vm2080_vm3, %v2019_v50, %v2079_v61 }
 0x1b9   :  { %v2025_v54 = vrot.slane %v2024_v57, 1 }
 0x1bb   :  { %v2026_v46 = vmax.f32 %v2024_v57, %v2025_v54 }
 0x1bd   :  { %v2088_v43 = vsel %vm2080_vm3, %v2026_v46, %v2087_v55 }
 0x1be   :  { %2512 = vmatprep.mubr.msk.f32.mxu1 %vm1928_vm12, %v2088_v43 }
 0x1bf   :  { %2157 = vmatmul.mubr.f32.vlgmr.msra.gmra.mxu1 %v2081_v44 }
 0x27f   :  { %v2158_v27 = vpop.f32.mrf.mxu1 }
 0x280   :  { %v2159_v22 = vadd.f32 %v2511_v47, %v2158_v27 }
 0x281   :  { %v2160_v35 = vpop.f32.mrf.mxu1 }
 0x282   :  { %2162 = vst [vmem:[%s4036_s6] sm:$0xff] %v2159_v22 }

</bundles_post_ra>
